<compile_context>
chip_gen: v5e
topology: v5e:2x2
jax: 0.10.0
libtpu: 0.0.40
codegen_flags: <defaults>
</compile_context>

<pallas_src>
import functools

import jax
import jax.numpy as jnp
from jax import lax
from jax.experimental import pallas as pl
from jax.experimental.pallas import tpu as pltpu

# Full-f32 matmuls everywhere (kernel + reference) so the correctness check is
# not dominated by XLA's default bf16 dot passes.
jax.config.update("jax_default_matmul_precision", "highest")

# ----------------------------- sizes (small, synthetic) ----------------------
B = 2          # batch (documents)
S = 8          # sentences per document (doc_len)
T = 12         # tokens per sentence
VOCAB = 100
EMB = 32       # token embedding dim
HID = 64       # sentence hidden size (bidirectional RNN hidden in the original)
POS_DIM = 16   # config.q_func.POS_DIM
POS_NUM = 32   # config.q_func.POS_NUM  (>= S)
SEG_NUM = 10   # config.q_func.SEG_NUM  (rel ids land in [0, 9])

HP = 128       # HID padded to a full 128-lane vreg row / MXU contraction width
SP = 128       # sentence axis padded to 128 so q / H stores are lane-dense


# ----------------------------- Pallas kernel ---------------------------------
def dqn_q_kernel(sent_ref, wde_ref, wd_ref, wsal_ref, wred_ref, wcon_ref,
                 sumi_ref, add_ref, q_ref, h_ref, d_ref):
    """Fused per-document forward (grid axis = batch).

        H      = tanh(sent @ W_de)                               (SP, HP)
        D      = tanh(mean_s(H) @ W_d)                           (1, HP)
        w_all  = w_content + W_sal @ D - W_red @ tanh(sum_i)     (1, HP)
        q[s]   = H[s, :] . w_all + abs_pos[s] + rel_pos[s] + bias

    All "row vector" intermediates are carried as 8 identical sublane rows so
    every matmul has sublane extent >= 8; the real row is sliced at the end.
    Zero-padded HID / sentence rows contribute exact zeros everywhere.
    """
    sent = sent_ref[0]                                             # (SP, EMB)
    h = jnp.tanh(jnp.dot(sent, wde_ref[...],
                         preferred_element_type=jnp.float32))      # (SP, HP)

    # Document representation (padded sentence rows of h are exact zeros).
    h_mean = jnp.sum(h, axis=0, keepdims=True) * (1.0 / S)         # (1, HP)
    h_mean8 = jnp.broadcast_to(h_mean, (8, HP))
    d8 = jnp.tanh(jnp.dot(h_mean8, wd_ref[...],
                          preferred_element_type=jnp.float32))     # (8, HP)

    # Bilinear folds: x @ W^T (contract the second index of W) -- MXU.
    tb = (((1,), (1,)), ((), ()))
    v_sal = lax.dot_general(d8, wsal_ref[...], dimension_numbers=tb,
                            preferred_element_type=jnp.float32)    # (8, HP)
    ts8 = jnp.broadcast_to(jnp.tanh(sumi_ref[...]), (8, HP))
    v_red = lax.dot_general(ts8, wred_ref[...], dimension_numbers=tb,
                            preferred_element_type=jnp.float32)    # (8, HP)
    w_all = wcon_ref[...] + v_sal - v_red                          # (8, HP)

    # Per-sentence scores on the MXU: (8, HP) x (SP, HP)^T -> (8, SP).
    scores = lax.dot_general(w_all, h, dimension_numbers=tb,
                             preferred_element_type=jnp.float32)   # (8, SP)

    q_ref[0] = scores[0:1] + add_ref[...]                          # (1, SP)
    h_ref[0] = h                                                   # (SP, HP)
    d_ref[0] = d8[0:1]                                             # (1, HP)


# ----------------------------- wrapper ----------------------------------------
def q_values_pallas(params, sent, sum_i):
    """Fused H / D / Q_i_j for all documents -- one pallas_call, grid over B."""

    def pad2(w, rows, cols):
        return jnp.pad(w, ((0, rows - w.shape[0]), (0, cols - w.shape[1])))

    # Zero-pad HID -> HP (and the lone row vectors) once, wrapper-side.
    wde = pad2(params["W_de"], EMB, HP)                   # (EMB, HP)
    wd = pad2(params["W_d"], HP, HP)                      # (HP, HP)
    wsal = pad2(params["W_sal"], HP, HP)                  # (HP, HP)
    wred = pad2(params["W_red"], HP, HP)                  # (HP, HP)
    wcon = pad2(params["w_content"], 1, HP)               # (1, HP)
    sumi = pad2(jnp.reshape(sum_i, (1, HID)), 1, HP)      # (1, HP)
    sent_p = jnp.pad(sent, ((0, 0), (0, SP - S), (0, 0))) # (B, SP, EMB)

    # Positional scores + scalar bias folded into one lane-dense (1, SP) row:
    #   rel_id = round((i + 1) * 9.0 / doc_len)   (round-half-to-even, as Python)
    abs_ids = jnp.arange(S)
    abs_p = params["abs_pos_embed"][abs_ids] @ params["w_abs"][0]          # (S,)
    rel_ids = jnp.round((abs_ids + 1) * 9.0 / S).astype(jnp.int32)
    rel_p = params["rel_pos_embed"][rel_ids] @ params["w_rel"][0]          # (S,)
    add_row = pad2((abs_p + rel_p + params["bias"][0])[None, :], 1, SP)    # (1, SP)

    grid_spec = pltpu.PrefetchScalarGridSpec(
        num_scalar_prefetch=0,
        grid=(B,),
        in_specs=[
            pl.BlockSpec((1, SP, EMB), lambda b: (b, 0, 0)),   # sentence reps
            pl.BlockSpec((EMB, HP), lambda b: (0, 0)),         # W_de
            pl.BlockSpec((HP, HP), lambda b: (0, 0)),          # W_d
            pl.BlockSpec((HP, HP), lambda b: (0, 0)),          # W_sal
            pl.BlockSpec((HP, HP), lambda b: (0, 0)),          # W_red
            pl.BlockSpec((1, HP), lambda b: (0, 0)),           # w_content
            pl.BlockSpec((1, HP), lambda b: (0, 0)),           # sum_i
            pl.BlockSpec((1, SP), lambda b: (0, 0)),           # pos + bias row
        ],
        out_specs=[
            pl.BlockSpec((1, 1, SP), lambda b: (b, 0, 0)),     # q (lane-dense)
            pl.BlockSpec((1, SP, HP), lambda b: (b, 0, 0)),    # H
            pl.BlockSpec((1, 1, HP), lambda b: (b, 0, 0)),     # D
        ],
    )
    q_p, h_p, d_p = pl.pallas_call(
        dqn_q_kernel,
        out_shape=(
            jax.ShapeDtypeStruct((B, 1, SP), jnp.float32),
            jax.ShapeDtypeStruct((B, SP, HP), jnp.float32),
            jax.ShapeDtypeStruct((B, 1, HP), jnp.float32),
        ),
        grid_spec=grid_spec,
        compiler_params=pltpu.CompilerParams(
            dimension_semantics=("parallel",)),   # v7x: shard docs across 2 TCs
    )(sent_p, wde, wd, wsal, wred, wcon, sumi, add_row)

    # Slice off the lane / HID padding (wrapper-side, cheap).
    return q_p[:, 0, :S], h_p[:, :S, :HID], d_p[:, 0, :HID]


# ----------------------------- DQN forward (glue + kernel) -------------------
def init_params(key):
    ks = jax.random.split(key, 12)
    u = lambda k, shape, a=0.1: jax.random.uniform(k, shape, jnp.float32, -a, a)
    return {
        # SentenceEncoder / DocumentEncoder stand-ins
        "tok_emb": u(ks[0], (VOCAB, EMB)),
        "W_se": u(ks[1], (EMB, EMB)),
        "W_de": u(ks[2], (EMB, HID)),
        "W_d": u(ks[3], (HID, HID)),
        # Q_i_j parameters (shapes match the PyTorch module)
        "w_content": u(ks[4], (1, HID)),          # nn.Linear(HID, 1, bias=False)
        "W_sal": u(ks[5], (HID, HID)),            # nn.Bilinear(HID, HID, 1)[0]
        "W_red": u(ks[6], (HID, HID)),            # nn.Bilinear(HID, HID, 1)[0]
        "bias": u(ks[7], (1,)),                   # nn.Parameter uniform(-0.1, 0.1)
        "w_abs": u(ks[8], (1, POS_DIM)),          # nn.Linear(POS_DIM, 1)
        "abs_pos_embed": u(ks[9], (POS_NUM, POS_DIM), 1.0),
        "rel_pos_embed": u(ks[10], (SEG_NUM, POS_DIM), 1.0),
        "w_rel": u(ks[11], (1, POS_DIM)),         # nn.Linear(POS_DIM, 1)
    }


def dqn_forward(params, x_tokens, sum_i, get_q_approx=True):
    # SentenceEncoder stand-in: embed tokens, mean-pool, project.
    emb = params["tok_emb"][x_tokens]                     # (B, S, T, EMB)
    sent = jnp.tanh(emb.mean(axis=2) @ params["W_se"])    # (B, S, EMB)
    if not get_q_approx:
        # DocumentEncoder stand-in outside the kernel path.
        H = jnp.tanh(sent @ params["W_de"])               # (B, S, HID)
        D = jnp.tanh(H.mean(axis=1) @ params["W_d"])      # (B, HID)
        return H, D, sent
    # Fused Pallas kernel: H, D and all Q_i_j terms in one call.
    q, H, D = q_values_pallas(params, sent, sum_i)        # (B,S), (B,S,HID), (B,HID)
    return q, H, D


def q_values_reference(params, H, D, sum_i):
    """Pure-JAX reference for the Q_i_j math (same semantics as the kernel)."""
    ts = jnp.tanh(jnp.broadcast_to(sum_i, (HID,)))
    content = H @ params["w_content"][0]                               # (B, S)
    salience = jnp.einsum("bsh,hk,bk->bs", H, params["W_sal"], D)
    redund = jnp.einsum("bsh,hk,k->bs", H, params["W_red"], ts)
    abs_ids = jnp.arange(S)
    abs_p = params["abs_pos_embed"][abs_ids] @ params["w_abs"][0]
    rel_ids = jnp.round((abs_ids + 1) * 9.0 / S).astype(jnp.int32)
    rel_p = params["rel_pos_embed"][rel_ids] @ params["w_rel"][0]
    return content + salience - redund + (abs_p + rel_p)[None, :] + params["bias"][0]


# ----------------------------- main ------------------------------------------
if __name__ == "__main__":
    key = jax.random.PRNGKey(0)
    kp, kx, ks = jax.random.split(key, 3)
    params = init_params(kp)

    x = jax.random.randint(kx, (B, S, T), 0, VOCAB)            # token ids
    sum_i = jax.random.uniform(ks, (HID,), jnp.float32, -0.5, 0.5)

    fwd = jax.jit(functools.partial(dqn_forward, get_q_approx=True))
    q, H, D = fwd(params, x, sum_i)
    q = jax.block_until_ready(q)

    q_ref = q_values_reference(params, H, D, sum_i)
    assert q.shape == (B, S)
    err = jnp.max(jnp.abs(q - q_ref))
    assert jnp.allclose(q, q_ref, atol=1e-4, rtol=1e-4), f"mismatch: max err {err}"

    print("KERNEL_OK")
</pallas_src>

<mosaic_0001>
module attributes {stable_mosaic.version = 11 : i64} {
  func.func @dqn_q_kernel(%arg0: i32, %arg1: memref<1x128x32xf32, #tpu.memory_space<vmem>>, %arg2: memref<32x128xf32, #tpu.memory_space<vmem>>, %arg3: memref<128x128xf32, #tpu.memory_space<vmem>>, %arg4: memref<128x128xf32, #tpu.memory_space<vmem>>, %arg5: memref<128x128xf32, #tpu.memory_space<vmem>>, %arg6: memref<1x128xf32, #tpu.memory_space<vmem>>, %arg7: memref<1x128xf32, #tpu.memory_space<vmem>>, %arg8: memref<1x128xf32, #tpu.memory_space<vmem>>, %arg9: memref<1x1x128xf32, #tpu.memory_space<vmem>>, %arg10: memref<1x128x128xf32, #tpu.memory_space<vmem>>, %arg11: memref<1x1x128xf32, #tpu.memory_space<vmem>>) attributes {dimension_semantics = [#tpu.dimension_semantics<parallel>], iteration_bounds = array<i64: 2>, scalar_prefetch = 0 : i64, scratch_operands = 0 : i64, tpu.core_type = #tpu.core_type<tc>, window_params = [{transform_indices = @transform_0, window_bounds = array<i64: 1, 128, 32>}, {pipeline_mode = #tpu.pipeline_mode<synchronous>, transform_indices = @transform_1, window_bounds = array<i64: 32, 128>}, {pipeline_mode = #tpu.pipeline_mode<synchronous>, transform_indices = @transform_2, window_bounds = array<i64: 128, 128>}, {pipeline_mode = #tpu.pipeline_mode<synchronous>, transform_indices = @transform_3, window_bounds = array<i64: 128, 128>}, {pipeline_mode = #tpu.pipeline_mode<synchronous>, transform_indices = @transform_4, window_bounds = array<i64: 128, 128>}, {pipeline_mode = #tpu.pipeline_mode<synchronous>, transform_indices = @transform_5, window_bounds = array<i64: 1, 128>}, {pipeline_mode = #tpu.pipeline_mode<synchronous>, transform_indices = @transform_6, window_bounds = array<i64: 1, 128>}, {pipeline_mode = #tpu.pipeline_mode<synchronous>, transform_indices = @transform_7, window_bounds = array<i64: 1, 128>}, {transform_indices = @transform_8, window_bounds = array<i64: 1, 1, 128>}, {transform_indices = @transform_9, window_bounds = array<i64: 1, 128, 128>}, {transform_indices = @transform_10, window_bounds = array<i64: 1, 1, 128>}]} {
    %c0 = arith.constant 0 : index
    %c0_0 = arith.constant 0 : index
    %c0_1 = arith.constant 0 : index
    %0 = vector.load %arg1[%c0, %c0_0, %c0_1] : memref<1x128x32xf32, #tpu.memory_space<vmem>>, vector<1x128x32xf32>
    %1 = vector.shape_cast %0 : vector<1x128x32xf32> to vector<128x32xf32>
    %c0_2 = arith.constant 0 : index
    %c0_3 = arith.constant 0 : index
    %2 = vector.load %arg2[%c0_2, %c0_3] : memref<32x128xf32, #tpu.memory_space<vmem>>, vector<32x128xf32>
    %cst = arith.constant dense<0.000000e+00> : vector<128x128xf32>
    %3 = tpu.matmul %1, %2, %cst {dimension_numbers = #tpu.dot_dimension_numbers<[1], [0], [0], [1], [0, 0, 1, 1], [], []>, precision = #tpu.contract_precision<fp32>} : vector<128x32xf32>, vector<32x128xf32>, vector<128x128xf32> -> vector<128x128xf32>
    %4 = math.tanh %3 : vector<128x128xf32>
    %cst_4 = arith.constant dense<0.000000e+00> : vector<128xf32>
    %5 = vector.multi_reduction <add>, %4, %cst_4 [0] : vector<128x128xf32> to vector<128xf32>
    %6 = vector.shape_cast %5 : vector<128xf32> to vector<1x128xf32>
    %cst_5 = arith.constant 1.250000e-01 : f32
    %7 = vector.broadcast %cst_5 : f32 to vector<1x128xf32>
    %8 = arith.mulf %6, %7 : vector<1x128xf32>
    %9 = vector.shape_cast %8 : vector<1x128xf32> to vector<1x128xf32>
    %10 = vector.broadcast %9 : vector<1x128xf32> to vector<8x128xf32>
    %c0_6 = arith.constant 0 : index
    %c0_7 = arith.constant 0 : index
    %11 = vector.load %arg3[%c0_6, %c0_7] : memref<128x128xf32, #tpu.memory_space<vmem>>, vector<128x128xf32>
    %cst_8 = arith.constant dense<0.000000e+00> : vector<8x128xf32>
    %12 = tpu.matmul %10, %11, %cst_8 {dimension_numbers = #tpu.dot_dimension_numbers<[1], [0], [0], [1], [0, 0, 1, 1], [], []>, precision = #tpu.contract_precision<fp32>} : vector<8x128xf32>, vector<128x128xf32>, vector<8x128xf32> -> vector<8x128xf32>
    %13 = math.tanh %12 : vector<8x128xf32>
    %c0_9 = arith.constant 0 : index
    %c0_10 = arith.constant 0 : index
    %14 = vector.load %arg4[%c0_9, %c0_10] : memref<128x128xf32, #tpu.memory_space<vmem>>, vector<128x128xf32>
    %cst_11 = arith.constant dense<0.000000e+00> : vector<8x128xf32>
    %15 = tpu.matmul %13, %14, %cst_11 {dimension_numbers = #tpu.dot_dimension_numbers<[1], [1], [0], [0], [0, 0, 1, 0], [], []>, precision = #tpu.contract_precision<fp32>} : vector<8x128xf32>, vector<128x128xf32>, vector<8x128xf32> -> vector<8x128xf32>
    %c0_12 = arith.constant 0 : index
    %c0_13 = arith.constant 0 : index
    %16 = vector.load %arg7[%c0_12, %c0_13] : memref<1x128xf32, #tpu.memory_space<vmem>>, vector<1x128xf32>
    %17 = math.tanh %16 : vector<1x128xf32>
    %18 = vector.shape_cast %17 : vector<1x128xf32> to vector<1x128xf32>
    %19 = vector.broadcast %18 : vector<1x128xf32> to vector<8x128xf32>
    %c0_14 = arith.constant 0 : index
    %c0_15 = arith.constant 0 : index
    %20 = vector.load %arg5[%c0_14, %c0_15] : memref<128x128xf32, #tpu.memory_space<vmem>>, vector<128x128xf32>
    %cst_16 = arith.constant dense<0.000000e+00> : vector<8x128xf32>
    %21 = tpu.matmul %19, %20, %cst_16 {dimension_numbers = #tpu.dot_dimension_numbers<[1], [1], [0], [0], [0, 0, 1, 0], [], []>, precision = #tpu.contract_precision<fp32>} : vector<8x128xf32>, vector<128x128xf32>, vector<8x128xf32> -> vector<8x128xf32>
    %c0_17 = arith.constant 0 : index
    %c0_18 = arith.constant 0 : index
    %22 = vector.load %arg6[%c0_17, %c0_18] : memref<1x128xf32, #tpu.memory_space<vmem>>, vector<1x128xf32>
    %23 = vector.broadcast %22 : vector<1x128xf32> to vector<8x128xf32>
    %24 = arith.addf %23, %15 : vector<8x128xf32>
    %25 = arith.subf %24, %21 : vector<8x128xf32>
    %cst_19 = arith.constant dense<0.000000e+00> : vector<8x128xf32>
    %26 = tpu.matmul %25, %4, %cst_19 {dimension_numbers = #tpu.dot_dimension_numbers<[1], [1], [0], [0], [0, 0, 1, 0], [], []>, precision = #tpu.contract_precision<fp32>} : vector<8x128xf32>, vector<128x128xf32>, vector<8x128xf32> -> vector<8x128xf32>
    %27 = vector.extract_strided_slice %26 {offsets = [0, 0], sizes = [1, 128], strides = [1, 1]} : vector<8x128xf32> to vector<1x128xf32>
    %c0_20 = arith.constant 0 : index
    %c0_21 = arith.constant 0 : index
    %28 = vector.load %arg8[%c0_20, %c0_21] : memref<1x128xf32, #tpu.memory_space<vmem>>, vector<1x128xf32>
    %29 = arith.addf %27, %28 : vector<1x128xf32>
    %c0_22 = arith.constant 0 : index
    %c0_23 = arith.constant 0 : index
    %c0_24 = arith.constant 0 : index
    %30 = vector.load %arg9[%c0_22, %c0_23, %c0_24] : memref<1x1x128xf32, #tpu.memory_space<vmem>>, vector<1x1x128xf32>
    %31 = vector.shape_cast %30 : vector<1x1x128xf32> to vector<1x128xf32>
    %32 = vector.shape_cast %29 : vector<1x128xf32> to vector<1x1x128xf32>
    tpu.vector_store %arg9[%c0_22, %c0_23, %c0_24], %32 {strides = array<i32>} : memref<1x1x128xf32, #tpu.memory_space<vmem>>, vector<1x1x128xf32>,
    %c0_25 = arith.constant 0 : index
    %c0_26 = arith.constant 0 : index
    %c0_27 = arith.constant 0 : index
    %33 = vector.load %arg10[%c0_25, %c0_26, %c0_27] : memref<1x128x128xf32, #tpu.memory_space<vmem>>, vector<1x128x128xf32>
    %34 = vector.shape_cast %33 : vector<1x128x128xf32> to vector<128x128xf32>
    %35 = vector.shape_cast %4 : vector<128x128xf32> to vector<1x128x128xf32>
    tpu.vector_store %arg10[%c0_25, %c0_26, %c0_27], %35 {strides = array<i32>} : memref<1x128x128xf32, #tpu.memory_space<vmem>>, vector<1x128x128xf32>,
    %36 = vector.extract_strided_slice %13 {offsets = [0, 0], sizes = [1, 128], strides = [1, 1]} : vector<8x128xf32> to vector<1x128xf32>
    %c0_28 = arith.constant 0 : index
    %c0_29 = arith.constant 0 : index
    %c0_30 = arith.constant 0 : index
    %37 = vector.load %arg11[%c0_28, %c0_29, %c0_30] : memref<1x1x128xf32, #tpu.memory_space<vmem>>, vector<1x1x128xf32>
    %38 = vector.shape_cast %37 : vector<1x1x128xf32> to vector<1x128xf32>
    %39 = vector.shape_cast %36 : vector<1x128xf32> to vector<1x1x128xf32>
    tpu.vector_store %arg11[%c0_28, %c0_29, %c0_30], %39 {strides = array<i32>} : memref<1x1x128xf32, #tpu.memory_space<vmem>>, vector<1x1x128xf32>,
    return
  }
  func.func @transform_0(%arg0: i32) -> (i32, i32, i32) {
    %c0_i32 = arith.constant 0 : i32
    %c0_i32_0 = arith.constant 0 : i32
    %c0_i32_1 = arith.constant 0 : i32
    return %arg0, %c0_i32, %c0_i32_0 : i32, i32, i32
  }
  func.func @transform_1(%arg0: i32) -> (i32, i32) {
    %c0_i32 = arith.constant 0 : i32
    %c0_i32_0 = arith.constant 0 : i32
    %c0_i32_1 = arith.constant 0 : i32
    return %c0_i32, %c0_i32_0 : i32, i32
  }
  func.func @transform_2(%arg0: i32) -> (i32, i32) {
    %c0_i32 = arith.constant 0 : i32
    %c0_i32_0 = arith.constant 0 : i32
    %c0_i32_1 = arith.constant 0 : i32
    return %c0_i32, %c0_i32_0 : i32, i32
  }
  func.func @transform_3(%arg0: i32) -> (i32, i32) {
    %c0_i32 = arith.constant 0 : i32
    %c0_i32_0 = arith.constant 0 : i32
    %c0_i32_1 = arith.constant 0 : i32
    return %c0_i32, %c0_i32_0 : i32, i32
  }
  func.func @transform_4(%arg0: i32) -> (i32, i32) {
    %c0_i32 = arith.constant 0 : i32
    %c0_i32_0 = arith.constant 0 : i32
    %c0_i32_1 = arith.constant 0 : i32
    return %c0_i32, %c0_i32_0 : i32, i32
  }
  func.func @transform_5(%arg0: i32) -> (i32, i32) {
    %c0_i32 = arith.constant 0 : i32
    %c0_i32_0 = arith.constant 0 : i32
    %c0_i32_1 = arith.constant 0 : i32
    return %c0_i32, %c0_i32_0 : i32, i32
  }
  func.func @transform_6(%arg0: i32) -> (i32, i32) {
    %c0_i32 = arith.constant 0 : i32
    %c0_i32_0 = arith.constant 0 : i32
    %c0_i32_1 = arith.constant 0 : i32
    return %c0_i32, %c0_i32_0 : i32, i32
  }
  func.func @transform_7(%arg0: i32) -> (i32, i32) {
    %c0_i32 = arith.constant 0 : i32
    %c0_i32_0 = arith.constant 0 : i32
    %c0_i32_1 = arith.constant 0 : i32
    return %c0_i32, %c0_i32_0 : i32, i32
  }
  func.func @transform_8(%arg0: i32) -> (i32, i32, i32) {
    %c0_i32 = arith.constant 0 : i32
    %c0_i32_0 = arith.constant 0 : i32
    %c0_i32_1 = arith.constant 0 : i32
    return %arg0, %c0_i32, %c0_i32_0 : i32, i32, i32
  }
  func.func @transform_9(%arg0: i32) -> (i32, i32, i32) {
    %c0_i32 = arith.constant 0 : i32
    %c0_i32_0 = arith.constant 0 : i32
    %c0_i32_1 = arith.constant 0 : i32
    return %arg0, %c0_i32, %c0_i32_0 : i32, i32, i32
  }
  func.func @transform_10(%arg0: i32) -> (i32, i32, i32) {
    %c0_i32 = arith.constant 0 : i32
    %c0_i32_0 = arith.constant 0 : i32
    %c0_i32_1 = arith.constant 0 : i32
    return %arg0, %c0_i32, %c0_i32_0 : i32, i32, i32
  }
}

</mosaic_0001>

<bundles_post_ra>
// kernel: dqn_forward.1
= control target key start
LH: loop header
LB: loop body
LE: loop exit
PB: predicated region body
PF: predicated region fallthrough
CT: control target
= control target key end

     0   :  { %s4652_s0 = inlined_call_operand.vmem [shape: f32[2,128,32], index: 0, kind: input, shape index: {}]   ;;  %s4653_s1 = inlined_call_operand.vmem [shape: f32[32,128], index: 1, kind: input, shape index: {}]   ;;  %s4654_s2 = inlined_call_operand.vmem [shape: f32[128,128], index: 2, kind: input, shape index: {}]   ;;  %s4655_s3 = inlined_call_operand.vmem [shape: f32[128,128], index: 3, kind: input, shape index: {}]   ;;  %s4656_s4 = inlined_call_operand.vmem [shape: f32[128,128], index: 4, kind: input, shape index: {}]   ;;  %s4657_s5 = inlined_call_operand.vmem [shape: f32[1,128], index: 5, kind: input, shape index: {}]   ;;  %s4658_s6 = inlined_call_operand.vmem [shape: f32[1,128], index: 6, kind: input, shape index: {}]   ;;  %s4659_s7 = inlined_call_operand.vmem [shape: f32[1,128], index: 7, kind: input, shape index: {}]   ;;  %s4660_s8 = inlined_call_operand.hbm [shape: f32[2,1,128], index: 8, kind: output, shape index: {0}]   ;;  %s4661_s9 = inlined_call_operand.vmem [shape: f32[2,128,128], index: 9, kind: output, shape index: {1}]   ;;  %s4662_s10 = inlined_call_operand.hbm [shape: f32[2,1,128], index: 10, kind: output, shape index: {2}]  }
   0x1   :  { %4675 = sst [smem:[#allocation8_spill]] %s4652_s0 }
   0x2   :  { %4676 = sst [smem:[#allocation9_spill]] %s4653_s1 }
   0x3   :  { %4677 = sst [smem:[#allocation10_spill]] %s4654_s2 }
   0x4   :  { %16 = vsyncpa [#allocation3], 0 }
   0x5   :  { %18 = vsyncpa [#allocation3 + $0x1], 0 }
   0x6   :  { %19 = vsyncpa [#allocation5], 0 }
   0x7   :  { %21 = vsyncpa [#allocation5 + $0x1], 0  ;;  %s2991_s13 = smov 0   ;;  %s2993_s14 = smov 0  }
   0x8   :  { %s2995_s15 = smov 0   ;;  %s2997_s16 = smov 0  }
   0x9 LB: > { %s3012_s17 = sadd.s32 4294967295, %s2934_s16   ;;  %s2726_s18 = sadd.s32 4294967294, %s2934_s16   ;;  %s2934_s16 = sphi %s2997_s16, %s4698_s16   ;;  %s2930_s15 = sphi %s2995_s15, %s4697_s15   ;;  %s2926_s14 = sphi %s2993_s14, %s4696_s14   ;;  %s2922_s13 = sphi %s2991_s13, %s4695_s13  }
   0xa   : > { %s3016_s19 = sadd.s32 1, %s2934_s16   ;;  %s207_s20 = sadd.s32 1, %s2930_s15 }
   0xb   : > { %s204_s21 = ssub.s32 %s2934_s16, %s3016_s19  ;;  %p217_p0 = scmp.ne.s32.totalorder %s2930_s15, %s2926_s14 }
   0xc   : > { %p205_p1 = scmp.eq.s32.totalorder %s204_s21, 0  ;;  %p218_p2 = scmp.eq.s32.totalorder %s3012_s17, 1 }
   0xd   : > { %p223_p3 = scmp.ne.s32.totalorder %s2926_s14, %s2922_s13  ;;  %p224_p4 = scmp.eq.s32.totalorder %s2726_s18, 1 }
   0xe   : > { %s3027_s22 = scalar_select %p205_p1, %s2930_s15, %s207_s20  }
   0xf   : > { %p3029_p5 = por %p218_p2, %p217_p0  ;;  %p3033_p6 = por %p224_p4, %p223_p3 }
  0x10   : > { %p2729_p7 = scmp.ge.s32.totalorder %s2934_s16, 1  ;;  %p323_p8 = scmp.lt.s32.totalorder %s2934_s16, 3 }
  0x12   : > { %p324_p9 = pnand %p2729_p7, %p323_p8 }
  0x13   : > { %s4680_s1 = sld [smem:[#allocation9_spill]] (!%p324_p9)  ;;  %p369_p10 = scmp.lt.s32.totalorder (!%p324_p9), %s3012_s17, 1 }
  0x14   : > { %327 = sbr.rel (%p324_p9) target bundleno = 961 (0x3c1), region = 52  ;;  %s4681_s0 = sld [smem:[#allocation8_spill]] (!%p324_p9) }
  0x15   : > { %s4682_s2 = sld [smem:[#allocation10_spill]] (!%p324_p9)  ;;  %s4241_s25 = sand.u32 (!%p324_p9), 1, %s2926_s14  }
  0x16   : > { %s2590_s27 = scalar_lea.sflag (!%p324_p9), [#allocation5], %s4241_s25 }
  0x19   : > { %v398_v0 = vld [vmem:[%s4680_s1 + $0x18] sm:$0xff]  ;;  %v397_v1 = vld [vmem:[%s4680_s1 + $0x10] sm:$0xff]  ;;  %v396_v2 = vld [vmem:[%s4680_s1 + $0x8] sm:$0xff]  ;;  %s3061_s18 = scalar_select %p369_p10, %s3012_s17, 1  ;;  %vm399_vm0 = vcmask 261120  }
  0x1a   : > { %v3049_v3 = vand.u32 4294901760, %v398_v0  ;;  %v3051_v4 = vand.u32 4294901760, %v397_v1  ;;  %v3053_v5 = vand.u32 4294901760, %v396_v2  ;;  %v395_v6 = vld [vmem:[%s4680_s1] sm:$0xff]  ;;  %s2860_s1 = scalar_lea.hbm %s4662_s10, 2 }
  0x1b   : > { %v3058_v7 = vand.u32 4294901760, %v395_v6  ;;  %s2736_s20 = sshll.u32 %s3061_s18, 7  ;;  %s2614_s18 = scalar_lea.hbm %s4662_s10, %s3012_s17 }
  0x1c   : > { %461 = vmatpush.msra.mxu0 %v3049_v3  ;;  %2738 = vmatpush.msra.mxu2 %v3049_v3  ;;  %v610_v8 = vsub.f32 %v398_v0, %v3049_v3  ;;  %v616_v9 = vsub.f32 %v397_v1, %v3051_v4  ;;  %v622_v10 = vsub.f32 %v396_v2, %v3053_v5  ;;  %s3079_s26 = scalar_lea.vmem %s4681_s0, %s2736_s20  ;;  %s3386_s11 = scalar_lea.vmem %s4661_s9, %s2736_s20 }
  0x1d   : > { %v3069_v11 = vsub.f32 %v395_v6, %v3058_v7  ;;  %v379_v16 = vld [vmem:[%s3079_s26] sm:$0xff]  ;;  %v380_v18 = vld [vmem:[%s3079_s26 + $0x8] sm:$0xff]  ;;  %v381_v27 = vld [vmem:[%s3079_s26 + $0x10] sm:$0xff]  ;;  %s2618_s21 = sshll.u32 %s2614_s18, 4  ;;  %s2619_s21 = int_to_ptr.hbm [resolvable:$true] %s2618_s21 }
  0x1e   : > { %v611_v12 = vand.u32 4294901760, %v610_v8  ;;  %463 = vmatpush.msra.mxu0 %v3051_v4  ;;  %2739 = vmatpush.msra.mxu2 %v3051_v4  ;;  %v617_v13 = vand.u32 4294901760, %v616_v9  ;;  %v623_v14 = vand.u32 4294901760, %v622_v10  ;;  %v391_v17 = vld [vmem:[%s3079_s26 + $0x60] sm:$0xff]  ;;  %v401_v22 = vsel %vm399_vm0, %v379_v16, 0  ;;  %v392_v23 = vld [vmem:[%s3079_s26 + $0x68] sm:$0xff] }
  0x1f   : > { %v629_v15 = vand.u32 4294901760, %v3069_v11  ;;  %v3089_v24 = vand.u32 4294901760, %v401_v22  ;;  %v437_v25 = vsel %vm399_vm0, %v391_v17, 0  ;;  %v404_v26 = vsel %vm399_vm0, %v380_v18, 0  ;;  %v393_v32 = vld [vmem:[%s3079_s26 + $0x70] sm:$0xff]  ;;  %v382_v53 = vld [vmem:[%s3079_s26 + $0x18] sm:$0xff] }
  0x20   : > { %v612_v19 = vsub.f32 %v610_v8, %v611_v12  ;;  %v618_v20 = vsub.f32 %v616_v9, %v617_v13  ;;  %465 = vmatpush.msra.mxu0 %v3053_v5  ;;  %2740 = vmatpush.msra.mxu2 %v3053_v5  ;;  %v624_v21 = vsub.f32 %v622_v10, %v623_v14  ;;  %v3097_v31 = vand.u32 4294901760, %v437_v25  ;;  %v394_v55 = vld [vmem:[%s3079_s26 + $0x78] sm:$0xff]  ;;  %v384_v16 = vld [vmem:[%s3079_s26 + $0x28] sm:$0xff]  ;;  %s2854_s28 = sshra.s32 %s2619_s21, 4  ;;  %s2855_s28 = int_to_ptr.hbm [resolvable:$true] %s2854_s28 }
  0x21   : > { %v630_v30 = vsub.f32 %v3069_v11, %v629_v15  ;;  %v3101_v33 = vsub.f32 %v401_v22, %v3089_v24  ;;  %v3103_v34 = vand.u32 4294901760, %v404_v26  ;;  %v440_v35 = vsel %vm399_vm0, %v392_v23, 0  ;;  %p2861_p0 = scmp.lt.s32.totalorder %s2855_s28, %s4662_s10 }
  0x22   : > { %v613_v28 = vand.u32 4294901760, %v612_v19  ;;  %v619_v29 = vand.u32 4294901760, %v618_v20  ;;  %467 = vmatpush.msra.mxu0 %v3058_v7  ;;  %2741 = vmatpush.msra.mxu2 %v3058_v7  ;;  %v625_v36 = vand.u32 4294901760, %v624_v21  ;;  %v3107_v37 = vsub.f32 %v437_v25, %v3097_v31  ;;  %v387_v25 = vld [vmem:[%s3079_s26 + $0x40] sm:$0xff] }
  0x23   : > { %v3109_v38 = vand.u32 4294901760, %v440_v35  ;;  %v407_v39 = vsel %vm399_vm0, %v381_v27, 0  ;;  %v470_v40 = vand.u32 4294901760, %v3101_v33  ;;  %v3114_v41 = vsub.f32 %v404_v26, %v3103_v34  ;;  %v385_v26 = vld [vmem:[%s3079_s26 + $0x30] sm:$0xff] }
  0x24   : > { %935 = vmatpush.msrb.mxu0 %v611_v12  ;;  %712 = vmatpush.msrb.mxu2 %v610_v8  ;;  %v443_v42 = vsel %vm399_vm0, %v393_v32, 0  ;;  %v631_v43 = vand.u32 4294901760, %v630_v30  ;;  %v566_v44 = vand.u32 4294901760, %v3107_v37  ;;  %v3125_v48 = vand.u32 4294901760, %v407_v39  ;;  %v383_v8 = vld [vmem:[%s3079_s26 + $0x20] sm:$0xff] }
  0x25   : > { %614 = vmatpush.msra.mxu1 %v613_v28  ;;  %2742 = vmatpush.msra.mxu3 %v613_v28  ;;  %v3119_v45 = vsub.f32 %v440_v35, %v3109_v38  ;;  %v471_v46 = vsub.f32 %v3101_v33, %v470_v40  ;;  %v478_v47 = vand.u32 4294901760, %v3114_v41  ;;  %v3131_v51 = vand.u32 4294901760, %v443_v42 }
  0x26   : > { %939 = vmatpush.msrb.mxu0 %v617_v13  ;;  %715 = vmatpush.msrb.mxu2 %v616_v9  ;;  %v567_v49 = vsub.f32 %v3107_v37, %v566_v44  ;;  %v3141_v57 = vsub.f32 %v407_v39, %v3125_v48  ;;  %v410_v60 = vsel %vm399_vm0, %v382_v53, 0  ;;  %v446_v61 = vsel %vm399_vm0, %v394_v55, 0  ;;  %v388_v39 = vld [vmem:[%s3079_s26 + $0x48] sm:$0xff] }
  0x27   : > { %620 = vmatpush.msra.mxu1 %v619_v29  ;;  %2743 = vmatpush.msra.mxu3 %v619_v29  ;;  %v574_v50 = vand.u32 4294901760, %v3119_v45  ;;  %v472_v52 = vand.u32 4294901760, %v471_v46  ;;  %v479_v56 = vsub.f32 %v3114_v41, %v478_v47  ;;  %v3148_v59 = vsub.f32 %v443_v42, %v3131_v51  ;;  %v386_v42 = vld [vmem:[%s3079_s26 + $0x38] sm:$0xff] }
  0x28   : > { %718 = vmatpush.msrb.mxu2 %v622_v10  ;;  %943 = vmatpush.msrb.mxu0 %v623_v14  ;;  %v568_v54 = vand.u32 4294901760, %v567_v49  ;;  %v486_v63 = vand.u32 4294901760, %v3141_v57  ;;  %v3155_v0 = vand.u32 4294901760, %v410_v60  ;;  %v3160_v6 = vand.u32 4294901760, %v446_v61 }
  0x29   : > { %626 = vmatpush.msra.mxu1 %v625_v36  ;;  %2744 = vmatpush.msra.mxu3 %v625_v36  ;;  %v575_v58 = vsub.f32 %v3119_v45, %v574_v50  ;;  %v480_v62 = vand.u32 4294901760, %v479_v56  ;;  %v582_v2 = vand.u32 4294901760, %v3148_v59  ;;  %v413_v10 = vsel %vm399_vm0, %v383_v8, 0  ;;  %v389_v56 = vld [vmem:[%s3079_s26 + $0x50] sm:$0xff] }
  0x2a   : > { %721 = vmatpush.msrb.mxu2 %v3069_v11  ;;  %947 = vmatpush.msrb.mxu0 %v629_v15  ;;  %v3183_v13 = vand.u32 4294901760, %v413_v10  ;;  %v416_v19 = vsel %vm399_vm0, %v384_v16, 0  ;;  %v425_v27 = vsel %vm399_vm0, %v387_v25, 0  ;;  %v419_v30 = vsel %vm399_vm0, %v385_v26, 0 }
  0x2b   : > { %632 = vmatpush.msra.mxu1 %v631_v43  ;;  %2745 = vmatpush.msra.mxu3 %v631_v43  ;;  %v576_v1 = vand.u32 4294901760, %v575_v58  ;;  %v583_v9 = vsub.f32 %v3148_v59, %v582_v2  ;;  %v3200_v22 = vand.u32 4294901760, %v416_v19  ;;  %v3215_v36 = vand.u32 4294901760, %v419_v30 }
  0x2c   : > { %473 = vmatmul.f32.vlgmr.msra.gmra.mxu0 %v472_v52  ;;  %634 = vmatmul.f32.vlgmr.msra.gmra.mxu1 %v3089_v24  ;;  %v428_v43 = vsel %vm399_vm0, %v388_v39, 0  ;;  %v422_v52 = vsel %vm399_vm0, %v386_v42, 0  ;;  %v431_v58 = vsel %vm399_vm0, %v389_v56, 0 }
  0x2d   : > { %569 = vmatmul.f32.vlgmr.msra.gmra.mxu2 %v568_v54  ;;  %682 = vmatmul.f32.vlgmr.msra.gmra.mxu3 %v3097_v31  ;;  %v584_v14 = vand.u32 4294901760, %v583_v9  ;;  %v3210_v29 = vsub.f32 %v416_v19, %v3200_v22  ;;  %v517_v49 = vsub.f32 %v419_v30, %v3215_v36  ;;  %v3227_v55 = vand.u32 4294901760, %v422_v52 }
  0x2e   : > { %1026 = vmatpush.msrb.mxu1 %v3049_v3  ;;  %816 = vmatpush.msrb.mxu3 %v3049_v3  ;;  %v487_v3 = vsub.f32 %v3141_v57, %v486_v63 }
  0x2f   : > { %v510_v35 = vand.u32 4294901760, %v3210_v29  ;;  %v518_v54 = vand.u32 4294901760, %v517_v49 }
  0x30   : > { %1028 = vmatpush.msrb.mxu1 %v3051_v4  ;;  %818 = vmatpush.msrb.mxu3 %v3051_v4  ;;  %v3170_v4 = vsub.f32 %v410_v60, %v3155_v0  ;;  %v488_v11 = vand.u32 4294901760, %v487_v3 }
  0x31   : > { %v511_v46 = vsub.f32 %v3210_v29, %v510_v35  ;;  %v519_v60 = vsub.f32 %v517_v49, %v518_v54 }
  0x32   : > { %820 = vmatpush.msrb.mxu3 %v3053_v5  ;;  %1030 = vmatpush.msrb.mxu1 %v3053_v5  ;;  %v3177_v5 = vsub.f32 %v446_v61, %v3160_v6  ;;  %v494_v12 = vand.u32 4294901760, %v3170_v4  ;;  %v525_v61 = vsub.f32 %v422_v52, %v3227_v55 }
  0x33   : > { %v512_v53 = vand.u32 4294901760, %v511_v46 }
  0x34   : > { %481 = vmatmul.f32.gmra.mxu0 %v480_v62  ;;  %638 = vmatmul.f32.gmra.mxu1 %v3103_v34  ;;  %v590_v15 = vand.u32 4294901760, %v3177_v5  ;;  %v495_v17 = vsub.f32 %v3170_v4, %v494_v12  ;;  %v3236_v62 = vand.u32 4294901760, %v425_v27 }
  0x35   : > { %577 = vmatmul.f32.gmra.mxu2 %v576_v1  ;;  %686 = vmatmul.f32.gmra.mxu3 %v3109_v38  ;;  %v390_v1 = vld [vmem:[%s3079_s26 + $0x58] sm:$0xff]  ;;  %s368_s26 = scalar_lea.vmem [#allocation4], %s4241_s25 }
  0x36   : > { %822 = vmatpush.msrb.mxu3 %v3058_v7  ;;  %1032 = vmatpush.msrb.mxu1 %v3058_v7  ;;  %v3192_v7 = vsub.f32 %v413_v10, %v3183_v13  ;;  %v591_v18 = vsub.f32 %v3177_v5, %v590_v15  ;;  %v496_v20 = vand.u32 4294901760, %v495_v17  ;;  %v434_v8 = vsel %vm399_vm0, %v390_v1, 0  ;;  %s2616_s20 = sshll.u32 %s368_s26, 4  ;;  %s2617_s20 = int_to_ptr.vmem [resolvable:$true] %s2616_s20 }
  0x37   : > { %v533_v9 = vsub.f32 %v425_v27, %v3236_v62  ;;  %v3245_v10 = vand.u32 4294901760, %v428_v43 }
  0x38   : > { %v502_v21 = vand.u32 4294901760, %v3192_v7  ;;  %v592_v23 = vand.u32 4294901760, %v591_v18  ;;  %v3252_v18 = vand.u32 4294901760, %v431_v58 }
  0x3a   : > { %v503_v28 = vsub.f32 %v3192_v7, %v502_v21 }
  0x3c   : > { %489 = vmatmul.f32.gmra.mxu0 %v488_v11  ;;  %642 = vmatmul.f32.gmra.mxu1 %v3125_v48  ;;  %v504_v32 = vand.u32 4294901760, %v503_v28 }
  0x3d   : > { %585 = vmatmul.f32.gmra.mxu2 %v584_v14  ;;  %690 = vmatmul.f32.gmra.mxu3 %v3131_v51  ;;  %v541_v14 = vsub.f32 %v428_v43, %v3245_v10 }
  0x3f   : > { %v542_v17 = vand.u32 4294901760, %v541_v14 }
  0x44   : > { %497 = vmatmul.f32.gmra.mxu0 %v496_v20  ;;  %646 = vmatmul.f32.gmra.mxu1 %v3155_v0 }
  0x45   : > { %593 = vmatmul.f32.gmra.mxu2 %v592_v23  ;;  %694 = vmatmul.f32.gmra.mxu3 %v3160_v6  ;;  %v3259_v23 = vand.u32 4294901760, %v434_v8 }
  0x4c   : > { %505 = vmatmul.f32.gmra.mxu0 %v504_v32  ;;  %650 = vmatmul.f32.gmra.mxu1 %v3183_v13 }
  0x4d   : > { %724 = vmatmul.f32.vlgmr.msrb.gmra.mxu2 %v3101_v33  ;;  %826 = vmatmul.f32.vlgmr.msrb.gmra.mxu3 %v470_v40  ;;  %v520_v33 = vand.u32 4294901760, %v519_v60  ;;  %v526_v40 = vand.u32 4294901760, %v525_v61 }
  0x4f   : > { %v527_v3 = vsub.f32 %v525_v61, %v526_v40 }
  0x54   : > { %513 = vmatmul.f32.gmra.mxu0 %v512_v53  ;;  %654 = vmatmul.f32.gmra.mxu1 %v3200_v22 }
  0x55   : > { %729 = vmatmul.f32.gmra.mxu2 %v3114_v41  ;;  %832 = vmatmul.f32.gmra.mxu3 %v478_v47  ;;  %v528_v41 = vand.u32 4294901760, %v527_v3  ;;  %v534_v47 = vand.u32 4294901760, %v533_v9 }
  0x57   : > { %v535_v11 = vsub.f32 %v533_v9, %v534_v47 }
  0x59   : > { %v536_v16 = vand.u32 4294901760, %v535_v11 }
  0x5c   : > { %521 = vmatmul.f32.gmra.mxu0 %v520_v33  ;;  %658 = vmatmul.f32.gmra.mxu1 %v3215_v36 }
  0x5d   : > { %734 = vmatmul.f32.gmra.mxu2 %v3141_v57  ;;  %838 = vmatmul.f32.gmra.mxu3 %v486_v63  ;;  %v543_v57 = vsub.f32 %v541_v14, %v542_v17  ;;  %v549_v63 = vsub.f32 %v431_v58, %v3252_v18 }
  0x5f   : > { %v544_v19 = vand.u32 4294901760, %v543_v57  ;;  %v550_v20 = vand.u32 4294901760, %v549_v63 }
  0x64   : > { %529 = vmatmul.f32.gmra.mxu0 %v528_v41  ;;  %662 = vmatmul.f32.gmra.mxu1 %v3227_v55 }
  0x65   : > { %739 = vmatmul.f32.gmra.mxu2 %v3170_v4  ;;  %844 = vmatmul.f32.gmra.mxu3 %v494_v12  ;;  %v551_v4 = vsub.f32 %v549_v63, %v550_v20  ;;  %v557_v12 = vsub.f32 %v434_v8, %v3259_v23 }
  0x67   : > { %v552_v25 = vand.u32 4294901760, %v551_v4  ;;  %v558_v26 = vand.u32 4294901760, %v557_v12 }
  0x6c   : > { %537 = vmatmul.f32.gmra.mxu0 %v536_v16  ;;  %666 = vmatmul.f32.gmra.mxu1 %v3236_v62 }
  0x6d   : > { %744 = vmatmul.f32.gmra.mxu2 %v3192_v7  ;;  %850 = vmatmul.f32.gmra.mxu3 %v502_v21  ;;  %v559_v7 = vsub.f32 %v557_v12, %v558_v26 }
  0x6f   : > { %v560_v21 = vand.u32 4294901760, %v559_v7 }
  0x74   : > { %545 = vmatmul.f32.gmra.mxu0 %v544_v19  ;;  %670 = vmatmul.f32.gmra.mxu1 %v3245_v10  ;;  %v1151_v19 = vld [vmem:[%s4682_s2 + $0x78] sm:$0xff] }
  0x75   : > { %749 = vmatmul.f32.gmra.mxu2 %v3210_v29  ;;  %856 = vmatmul.f32.gmra.mxu3 %v510_v35 }
  0x7c   : > { %553 = vmatmul.f32.gmra.mxu0 %v552_v25  ;;  %674 = vmatmul.f32.gmra.mxu1 %v3252_v18 }
  0x7d   : > { %754 = vmatmul.f32.gmra.mxu2 %v517_v49  ;;  %862 = vmatmul.f32.gmra.mxu3 %v518_v54 }
  0x84   : > { %561 = vmatmul.f32.gmra.mxu0 %v560_v21  ;;  %678 = vmatmul.f32.gmra.mxu1 %v3259_v23 }
  0x85   : > { %759 = vmatmul.f32.gmra.mxu2 %v525_v61  ;;  %868 = vmatmul.f32.gmra.mxu3 %v526_v40 }
  0x8c   : > { %949 = vmatmul.f32.vlgmr.msrb.gmra.mxu0 %v3089_v24  ;;  %1034 = vmatmul.f32.vlgmr.msrb.gmra.mxu1 %v3089_v24 }
  0x8d   : > { %764 = vmatmul.f32.gmra.mxu2 %v533_v9  ;;  %874 = vmatmul.f32.gmra.mxu3 %v534_v47 }
  0x94   : > { %953 = vmatmul.f32.gmra.mxu0 %v3103_v34  ;;  %1038 = vmatmul.f32.gmra.mxu1 %v3103_v34 }
  0x95   : > { %769 = vmatmul.f32.gmra.mxu2 %v541_v14  ;;  %880 = vmatmul.f32.gmra.mxu3 %v542_v17 }
  0x9c   : > { %957 = vmatmul.f32.gmra.mxu0 %v3125_v48  ;;  %1042 = vmatmul.f32.gmra.mxu1 %v3125_v48 }
  0x9d   : > { %774 = vmatmul.f32.gmra.mxu2 %v549_v63  ;;  %886 = vmatmul.f32.gmra.mxu3 %v550_v20 }
  0xa4   : > { %961 = vmatmul.f32.gmra.mxu0 %v3155_v0  ;;  %1046 = vmatmul.f32.gmra.mxu1 %v3155_v0 }
  0xa5   : > { %779 = vmatmul.f32.gmra.mxu2 %v557_v12  ;;  %892 = vmatmul.f32.gmra.mxu3 %v558_v26 }
  0xa9   : > { %v3274_v24 = vpop.f32.mrf.mxu0  ;;  %v3276_v27 = vpop.f32.mrf.mxu1 }
  0xaa   : > { %v636_v41 = vadd.f32 %v3276_v27, %v3274_v24 }
  0xac   : > { %965 = vmatmul.f32.gmra.mxu0 %v3183_v13  ;;  %1050 = vmatmul.f32.gmra.mxu1 %v3183_v13 }
  0xad   : > { %784 = vmatmul.f32.gmra.mxu2 %v3107_v37  ;;  %898 = vmatmul.f32.gmra.mxu3 %v566_v44 }
  0xb0   : > { %v3283_v34 = vpop.f32.mrf.mxu2  ;;  %v3285_v48 = vpop.f32.mrf.mxu3 }
  0xb1   : > { %v3287_v0 = vpop.f32.mrf.mxu0  ;;  %v3289_v28 = vpop.f32.mrf.mxu1 }
  0xb4   : > { %969 = vmatmul.f32.gmra.mxu0 %v3200_v22  ;;  %1054 = vmatmul.f32.gmra.mxu1 %v3200_v22 }
  0xb5   : > { %789 = vmatmul.f32.gmra.mxu2 %v3119_v45  ;;  %904 = vmatmul.f32.gmra.mxu3 %v574_v50 }
  0xb8   : > { %v3296_v13 = vpop.f32.mrf.mxu2  ;;  %v3298_v37 = vpop.f32.mrf.mxu3 }
  0xb9   : > { %v3300_v44 = vpop.f32.mrf.mxu0  ;;  %v3302_v29 = vpop.f32.mrf.mxu1 }
  0xba   : > { %v644_v26 = vadd.f32 %v3302_v29, %v3300_v44 }
  0xbc   : > { %973 = vmatmul.f32.gmra.mxu0 %v3215_v36  ;;  %1058 = vmatmul.f32.gmra.mxu1 %v3215_v36 }
  0xbd   : > { %794 = vmatmul.f32.gmra.mxu2 %v3148_v59  ;;  %910 = vmatmul.f32.gmra.mxu3 %v582_v2 }
  0xc0   : > { %v3309_v22 = vpop.f32.mrf.mxu2  ;;  %v3311_v45 = vpop.f32.mrf.mxu3 }
  0xc1   : > { %v3313_v50 = vpop.f32.mrf.mxu0  ;;  %v3315_v30 = vpop.f32.mrf.mxu1 }
  0xc4   : > { %977 = vmatmul.f32.gmra.mxu0 %v3227_v55  ;;  %1062 = vmatmul.f32.gmra.mxu1 %v3227_v55 }
  0xc5   : > { %799 = vmatmul.f32.gmra.mxu2 %v3177_v5  ;;  %916 = vmatmul.f32.gmra.mxu3 %v590_v15 }
  0xc8   : > { %v594_v32 = vpop.f32.mrf.mxu2  ;;  %v695_v59 = vpop.f32.mrf.mxu3 }
  0xc9   : > { %v3322_v2 = vpop.f32.mrf.mxu0  ;;  %v3324_v35 = vpop.f32.mrf.mxu1  ;;  %v3326_v36 = vadd.f32 %v695_v59, %v594_v32  ;;  %v1150_v59 = vld [vmem:[%s4682_s2 + $0x70] sm:$0xff] }
  0xcc   : > { %981 = vmatmul.f32.gmra.mxu0 %v3236_v62  ;;  %1066 = vmatmul.f32.gmra.mxu1 %v3236_v62 }
  0xd0   : > { %v725_v49 = vpop.f32.mrf.mxu2  ;;  %v827_v52 = vpop.f32.mrf.mxu3 }
  0xd1   : > { %v3330_v39 = vpop.f32.mrf.mxu0  ;;  %v3332_v42 = vpop.f32.mrf.mxu1 }
  0xd4   : > { %985 = vmatmul.f32.gmra.mxu0 %v3245_v10  ;;  %1070 = vmatmul.f32.gmra.mxu1 %v3245_v10  ;;  %v726_v10 = vadd.f32 %v725_v49, %v636_v41 }
  0xd6   : > { %v828_v11 = vadd.f32 %v827_v52, %v726_v10  ;;  %v3398_v52 = vand.u32 4294901760, %v1150_v59  ;;  %v1149_v10 = vld [vmem:[%s4682_s2 + $0x68] sm:$0xff] }
  0xd8   : > { %v730_v55 = vpop.f32.mrf.mxu2  ;;  %v833_v56 = vpop.f32.mrf.mxu3 }
  0xd9   : > { %v3336_v5 = vpop.f32.mrf.mxu0  ;;  %v3338_v15 = vpop.f32.mrf.mxu1 }
  0xdc   : > { %989 = vmatmul.f32.gmra.mxu0 %v3252_v18  ;;  %1074 = vmatmul.f32.gmra.mxu1 %v3252_v18 }
  0xe0   : > { %v735_v33 = vpop.f32.mrf.mxu2  ;;  %v839_v1 = vpop.f32.mrf.mxu3 }
  0xe1   : > { %v3342_v43 = vpop.f32.mrf.mxu0  ;;  %v3344_v46 = vpop.f32.mrf.mxu1  ;;  %v736_v27 = vadd.f32 %v735_v33, %v644_v26 }
  0xe3   : > { %v840_v44 = vadd.f32 %v839_v1, %v736_v27 }
  0xe4   : > { %993 = vmatmul.f32.gmra.mxu0 %v3259_v23  ;;  %1078 = vmatmul.f32.gmra.mxu1 %v3259_v23  ;;  %v3375_v23 = vand.u32 4294901760, %v1151_v19 }
  0xe6   : > { %1153 = vmatpush.msra.mxu2 %v3375_v23  ;;  %v3379_v4 = vsub.f32 %v1151_v19, %v3375_v23 }
  0xe8   : > { %v1195_v21 = vand.u32 4294901760, %v3379_v4  ;;  %1155 = vmatpush.msra.mxu2 %v3398_v52 }
  0xe9   : > { %v3348_v53 = vpop.f32.mrf.mxu0  ;;  %v3350_v54 = vpop.f32.mrf.mxu1 }
  0xea   : > { %v1196_v32 = vsub.f32 %v3379_v4, %v1195_v21 }
  0xec   : > { %997 = vmatmul.f32.gmra.mxu0 %v3097_v31  ;;  %1082 = vmatmul.f32.gmra.mxu1 %v3097_v31  ;;  %v740_v31 = vpop.f32.mrf.mxu2  ;;  %v1197_v49 = vand.u32 4294901760, %v1196_v32 }
  0xee   : > { %1198 = vmatpush.msra.mxu3 %v1197_v49 }
  0xf1   : > { %v546_v58 = vpop.f32.mrf.mxu0  ;;  %v671_v60 = vpop.f32.mrf.mxu1 }
  0xf2   : > { %v3354_v61 = vadd.f32 %v671_v60, %v546_v58  ;;  %v648_v60 = vadd.f32 %v3315_v30, %v3313_v50  ;;  %v3414_v50 = vand.u32 4294901760, %v1149_v10 }
  0xf4   : > { %1001 = vmatmul.f32.gmra.mxu0 %v3109_v38  ;;  %1086 = vmatmul.f32.gmra.mxu1 %v3109_v38  ;;  %v845_v38 = vpop.f32.mrf.mxu3  ;;  %v745_v17 = vpop.f32.mrf.mxu2 }
  0xf5   : > { %1157 = vmatpush.msra.mxu2 %v3414_v50 }
  0xf9   : > { %v554_v40 = vpop.f32.mrf.mxu0  ;;  %v675_v62 = vpop.f32.mrf.mxu1 }
  0xfa   : > { %v3358_v8 = vadd.f32 %v675_v62, %v554_v40 }
  0xfc   : > { %1005 = vmatmul.f32.gmra.mxu0 %v3131_v51  ;;  %1090 = vmatmul.f32.gmra.mxu1 %v3131_v51  ;;  %v640_v51 = vadd.f32 %v3289_v28, %v3287_v0  ;;  %v3373_v20 = vpop.f32.mrf.mxu3  ;;  %v750_v0 = vpop.f32.mrf.mxu2 }
  0xfe   : > { %v731_v57 = vadd.f32 %v730_v55, %v640_v51  ;;  %v3402_v55 = vsub.f32 %v1150_v59, %v3398_v52  ;;  %v656_v59 = vadd.f32 %v3332_v42, %v3330_v39 }
 0x100   : > { %v1201_v40 = vand.u32 4294901760, %v3402_v55 }
 0x101   : > { %v562_v3 = vpop.f32.mrf.mxu0  ;;  %v679_v9 = vpop.f32.mrf.mxu1 }
 0x102   : > { %v3364_v47 = vadd.f32 %v679_v9, %v562_v3  ;;  %v741_v3 = vadd.f32 %v740_v31, %v648_v60  ;;  %v1202_v1 = vsub.f32 %v3402_v55, %v1201_v40  ;;  %v3418_v31 = vsub.f32 %v1149_v10, %v3414_v50 }
 0x103   : > { %v660_v10 = vadd.f32 %v3338_v15, %v3336_v5 }
 0x104   : > { %1009 = vmatmul.f32.gmra.mxu0 %v3160_v6  ;;  %1094 = vmatmul.f32.gmra.mxu1 %v3160_v6  ;;  %v834_v6 = vadd.f32 %v833_v56, %v731_v57  ;;  %v857_v29 = vpop.f32.mrf.mxu3  ;;  %v846_v30 = vadd.f32 %v845_v38, %v741_v3  ;;  %v1207_v19 = vand.u32 4294901760, %v3418_v31  ;;  %v1147_v3 = vld [vmem:[%s4682_s2 + $0x58] sm:$0xff] }
 0x105   : > { %v3447_v39 = vand.u32 4294901760, %v1147_v3 }
 0x106   : > { %v1208_v38 = vsub.f32 %v3418_v31, %v1207_v19 }
 0x109   : > { %v950_v14 = vpop.f32.mrf.mxu0  ;;  %v1035_v16 = vpop.f32.mrf.mxu1 }
 0x10a   : > { %v951_v18 = vadd.f32 %v950_v14, %v828_v11  ;;  %v755_v11 = vpop.f32.mrf.mxu2  ;;  %v1203_v14 = vand.u32 4294901760, %v1202_v1 }
 0x10c   : > { %v1036_v63 = vadd.f32 %v1035_v16, %v951_v18  ;;  %1204 = vmatpush.msra.mxu3 %v1203_v14  ;;  %v652_v18 = vadd.f32 %v3324_v35, %v3322_v2  ;;  %v863_v57 = vpop.f32.mrf.mxu3 }
 0x10e   : > { %2791 = vtanh.f32 %v1036_v63 }
 0x111   : > { %v954_v12 = vpop.f32.mrf.mxu0  ;;  %v1039_v25 = vpop.f32.mrf.mxu1 }
 0x112   : > { %v955_v7 = vadd.f32 %v954_v12, %v834_v6  ;;  %v746_v12 = vadd.f32 %v745_v17, %v652_v18  ;;  %v760_v27 = vpop.f32.mrf.mxu2  ;;  %v756_v18 = vadd.f32 %v755_v11, %v660_v10 }
 0x114   : > { %v2792_v24 = vpop.eup %2791  ;;  %v1040_v28 = vadd.f32 %v1039_v25, %v955_v7  ;;  %v1148_v7 = vld [vmem:[%s4682_s2 + $0x60] sm:$0xff]  ;;  %v852_v35 = vadd.f32 %v3373_v20, %v746_v12  ;;  %v869_v60 = vpop.f32.mrf.mxu3  ;;  %v1146_v12 = vld [vmem:[%s4682_s2 + $0x50] sm:$0xff] }
 0x115   : > { %2563 = vst [vmem:[%s3386_s11] sm:$0xff] %v2792_v24  ;;  %v3430_v2 = vand.u32 4294901760, %v1148_v7  ;;  %v3463_v15 = vand.u32 4294901760, %v1146_v12 }
 0x116   : > { %2793 = vtanh.f32 %v1040_v28 }
 0x117   : > { %1159 = vmatpush.msra.mxu2 %v3430_v2  ;;  %v3435_v17 = vsub.f32 %v1148_v7, %v3430_v2  ;;  %v3467_v11 = vsub.f32 %v1146_v12, %v3463_v15 }
 0x119   : > { %v958_v56 = vpop.f32.mrf.mxu0  ;;  %v1043_v58 = vpop.f32.mrf.mxu1  ;;  %1161 = vmatpush.msra.mxu2 %v3447_v39 }
 0x11a   : > { %v959_v33 = vadd.f32 %v958_v56, %v840_v44  ;;  %v4672_v44 = vand.u32 4294901760, %v3435_v17  ;;  %v765_v14 = vpop.f32.mrf.mxu2 }
 0x11b   : > { %1163 = vmatpush.msra.mxu2 %v3463_v15 }
 0x11c   : > { %v2794_v62 = vpop.eup %2793  ;;  %v1044_v9 = vadd.f32 %v1043_v58, %v959_v33  ;;  %v751_v58 = vadd.f32 %v750_v0, %v656_v59  ;;  %v1214_v33 = vsub.f32 %v3435_v17, %v4672_v44  ;;  %v3451_v0 = vsub.f32 %v1147_v3, %v3447_v39 }
 0x11d   : > { %v1114_v41 = vadd.f32 %v2794_v62, %v2792_v24  ;;  %2564 = vst [vmem:[%s3386_s11 + $0x8] sm:$0xff] %v2794_v62  ;;  %v1209_v24 = vand.u32 4294901760, %v1208_v38  ;;  %v864_v38 = vadd.f32 %v863_v57, %v756_v18  ;;  %v1144_v18 = vld [vmem:[%s4682_s2 + $0x40] sm:$0xff] }
 0x11e   : > { %2795 = vtanh.f32 %v1044_v9  ;;  %v1215_v9 = vand.u32 4294901760, %v1214_v33  ;;  %v858_v42 = vadd.f32 %v857_v29, %v751_v58 }
 0x11f   : > { %1210 = vmatpush.msra.mxu3 %v1209_v24  ;;  %v664_v24 = vadd.f32 %v3344_v46, %v3342_v43 }
 0x121   : > { %v962_v16 = vpop.f32.mrf.mxu0  ;;  %v1047_v51 = vpop.f32.mrf.mxu1  ;;  %1216 = vmatpush.msra.mxu3 %v1215_v9  ;;  %v761_v59 = vadd.f32 %v760_v27, %v664_v24 }
 0x122   : > { %v963_v63 = vadd.f32 %v962_v16, %v846_v30  ;;  %v4671_v16 = vand.u32 4294901760, %v3451_v0 }
 0x123   : > { %v870_v33 = vadd.f32 %v869_v60, %v761_v59 }
 0x124   : > { %v2796_v6 = vpop.eup %2795  ;;  %v1048_v25 = vadd.f32 %v1047_v51, %v963_v63  ;;  %v1220_v29 = vsub.f32 %v3451_v0, %v4671_v16 }
 0x125   : > { %v1115_v26 = vadd.f32 %v2796_v6, %v1114_v41  ;;  %2565 = vst [vmem:[%s3386_s11 + $0x10] sm:$0xff] %v2796_v6 }
 0x126   : > { %2797 = vtanh.f32 %v1048_v25  ;;  %v875_v25 = vpop.f32.mrf.mxu3  ;;  %v1221_v5 = vand.u32 4294901760, %v1220_v29 }
 0x128   : > { %1222 = vmatpush.msra.mxu3 %v1221_v5 }
 0x129   : > { %v966_v28 = vpop.f32.mrf.mxu0  ;;  %v1051_v32 = vpop.f32.mrf.mxu1 }
 0x12a   : > { %v967_v49 = vadd.f32 %v966_v28, %v852_v35  ;;  %v4670_v28 = vand.u32 4294901760, %v3467_v11 }
 0x12c   : > { %v2798_v56 = vpop.eup %2797  ;;  %v1052_v20 = vadd.f32 %v1051_v32, %v967_v49  ;;  %v770_v49 = vpop.f32.mrf.mxu2  ;;  %v1226_v57 = vsub.f32 %v3467_v11, %v4670_v28 }
 0x12d   : > { %v1116_v62 = vadd.f32 %v2798_v56, %v1115_v26  ;;  %2566 = vst [vmem:[%s3386_s11 + $0x18] sm:$0xff] %v2798_v56  ;;  %v771_v59 = vadd.f32 %v770_v49, %v3354_v61  ;;  %v1140_v49 = vld [vmem:[%s4682_s2 + $0x20] sm:$0xff] }
 0x12e   : > { %2799 = vtanh.f32 %v1052_v20  ;;  %v1145_v20 = vld [vmem:[%s4682_s2 + $0x48] sm:$0xff]  ;;  %v1227_v43 = vand.u32 4294901760, %v1226_v57  ;;  %v881_v27 = vpop.f32.mrf.mxu3 }
 0x12f   : > { %v3481_v46 = vand.u32 4294901760, %v1145_v20 }
 0x130   : > { %1228 = vmatpush.msra.mxu3 %v1227_v43 }
 0x131   : > { %v970_v1 = vpop.f32.mrf.mxu0  ;;  %v1055_v41 = vpop.f32.mrf.mxu1  ;;  %1165 = vmatpush.msra.mxu2 %v3481_v46 }
 0x132   : > { %v971_v30 = vadd.f32 %v970_v1, %v858_v42  ;;  %v668_v42 = vadd.f32 %v3350_v54, %v3348_v53  ;;  %v3500_v54 = vand.u32 4294901760, %v1144_v18 }
 0x134   : > { %v2800_v51 = vpop.eup %2799  ;;  %v1056_v63 = vadd.f32 %v1055_v41, %v971_v30  ;;  %v766_v30 = vadd.f32 %v765_v14, %v668_v42  ;;  %v1143_v14 = vld [vmem:[%s4682_s2 + $0x38] sm:$0xff]  ;;  %1167 = vmatpush.msra.mxu2 %v3500_v54 }
 0x135   : > { %v1117_v6 = vadd.f32 %v2800_v51, %v1116_v62  ;;  %2567 = vst [vmem:[%s3386_s11 + $0x20] sm:$0xff] %v2800_v51  ;;  %v3485_v62 = vsub.f32 %v1145_v20, %v3481_v46  ;;  %v3509_v12 = vand.u32 4294901760, %v1143_v14 }
 0x136   : > { %2801 = vtanh.f32 %v1056_v63  ;;  %v775_v63 = vpop.f32.mrf.mxu2  ;;  %v876_v29 = vadd.f32 %v875_v25, %v766_v30 }
 0x137   : > { %v4668_v41 = vand.u32 4294901760, %v3485_v62  ;;  %1169 = vmatpush.msra.mxu2 %v3509_v12 }
 0x139   : > { %v974_v26 = vpop.f32.mrf.mxu0  ;;  %v1059_v7 = vpop.f32.mrf.mxu1  ;;  %v1232_v60 = vsub.f32 %v3485_v62, %v4668_v41 }
 0x13a   : > { %v975_v35 = vadd.f32 %v974_v26, %v864_v38  ;;  %v1142_v26 = vld [vmem:[%s4682_s2 + $0x30] sm:$0xff] }
 0x13b   : > { %v1233_v53 = vand.u32 4294901760, %v1232_v60  ;;  %v1139_v60 = vld [vmem:[%s4682_s2 + $0x18] sm:$0xff] }
 0x13c   : > { %v2802_v32 = vpop.eup %2801  ;;  %v1060_v56 = vadd.f32 %v1059_v7, %v975_v35  ;;  %v3514_v7 = vpop.f32.mrf.mxu3  ;;  %v3519_v35 = vsub.f32 %v1143_v14, %v3509_v12 }
 0x13d   : > { %v3475_v58 = vadd.f32 %v2802_v32, %v1117_v6  ;;  %2568 = vst [vmem:[%s3386_s11 + $0x28] sm:$0xff] %v2802_v32  ;;  %1234 = vmatpush.msra.mxu3 %v1233_v53  ;;  %v3507_v6 = vsub.f32 %v1144_v18, %v3500_v54  ;;  %v3521_v32 = vand.u32 4294901760, %v1142_v26  ;;  %v882_v18 = vadd.f32 %v881_v27, %v771_v59  ;;  %v1138_v27 = vld [vmem:[%s4682_s2 + $0x10] sm:$0xff] }
 0x13e   : > { %2803 = vtanh.f32 %v1060_v56  ;;  %v1141_v56 = vld [vmem:[%s4682_s2 + $0x28] sm:$0xff]  ;;  %v780_v53 = vpop.f32.mrf.mxu2 }
 0x13f   : > { %v4666_v25 = vand.u32 4294901760, %v3507_v6  ;;  %1171 = vmatpush.msra.mxu2 %v3521_v32  ;;  %v3539_v61 = vand.u32 4294901760, %v1141_v56 }
 0x141   : > { %v978_v3 = vpop.f32.mrf.mxu0  ;;  %v1063_v9 = vpop.f32.mrf.mxu1  ;;  %v1238_v43 = vsub.f32 %v3507_v6, %v4666_v25  ;;  %v3549_v30 = vsub.f32 %v1141_v56, %v3539_v61  ;;  %1173 = vmatpush.msra.mxu2 %v3539_v61  ;;  %v1136_v25 = vld [vmem:[%s4682_s2] sm:$0xff] }
 0x142   : > { %v979_v1 = vadd.f32 %v978_v3, %v870_v33  ;;  %v4665_v33 = vand.u32 4294901760, %v3519_v35  ;;  %v3535_v3 = vsub.f32 %v1142_v26, %v3521_v32 }
 0x144   : > { %v3490_v10 = vpop.eup %2803  ;;  %v1064_v51 = vadd.f32 %v1063_v9, %v979_v1  ;;  %v1239_v9 = vand.u32 4294901760, %v1238_v43  ;;  %v1244_v42 = vsub.f32 %v3519_v35, %v4665_v33  ;;  %v4663_v1 = vand.u32 4294901760, %v3535_v3 }
 0x145   : > { %2569 = vst [vmem:[%s3386_s11 + $0x30] sm:$0xff] %v3490_v10 }
 0x146   : > { %2805 = vtanh.f32 %v1064_v51  ;;  %v3552_v51 = vand.u32 4294901760, %v1140_v49  ;;  %1240 = vmatpush.msra.mxu3 %v1239_v9  ;;  %v1245_v14 = vand.u32 4294901760, %v1244_v42  ;;  %v3573_v9 = vand.u32 4294901760, %v1138_v27 }
 0x147   : > { %v776_v42 = vadd.f32 %v775_v63, %v3358_v8 }
 0x148   : > { %v3564_v56 = vsub.f32 %v1140_v49, %v3552_v51  ;;  %1175 = vmatpush.msra.mxu2 %v3552_v51  ;;  %1246 = vmatpush.msra.mxu3 %v1245_v14  ;;  %v3586_v8 = vsub.f32 %v1138_v27, %v3573_v9 }
 0x149   : > { %v982_v5 = vpop.f32.mrf.mxu0  ;;  %v1067_v38 = vpop.f32.mrf.mxu1 }
 0x14a   : > { %v983_v24 = vadd.f32 %v982_v5, %v876_v29  ;;  %v1250_v29 = vsub.f32 %v3535_v3, %v4663_v1  ;;  %v3560_v5 = vand.u32 4294901760, %v1139_v60  ;;  %v4667_v1 = vand.u32 4294901760, %v3564_v56 }
 0x14b   : > { %v1273_v27 = vand.u32 4294901760, %v3586_v8 }
 0x14c   : > { %v3527_v57 = vpop.eup %2805  ;;  %v1068_v20 = vadd.f32 %v1067_v38, %v983_v24  ;;  %v4664_v24 = vand.u32 4294901760, %v3549_v30  ;;  %v3571_v43 = vsub.f32 %v1139_v60, %v3560_v5  ;;  %1177 = vmatpush.msra.mxu2 %v3560_v5  ;;  %v1262_v33 = vsub.f32 %v3564_v56, %v4667_v1 }
 0x14d   : > { %2570 = vst [vmem:[%s3386_s11 + $0x38] sm:$0xff] %v3527_v57  ;;  %v3607_v1 = vand.u32 4294901760, %v1136_v25 }
 0x14e   : > { %2807 = vtanh.f32 %v1068_v20  ;;  %v1251_v20 = vand.u32 4294901760, %v1250_v29  ;;  %v1256_v49 = vsub.f32 %v3549_v30, %v4664_v24  ;;  %v893_v29 = vpop.f32.mrf.mxu3  ;;  %1179 = vmatpush.msra.mxu2 %v3573_v9 }
 0x150   : > { %1252 = vmatpush.msra.mxu3 %v1251_v20  ;;  %v1257_v24 = vand.u32 4294901760, %v1256_v49  ;;  %v1119_v20 = vadd.f32 %v3490_v10, %v3475_v58  ;;  %v1263_v49 = vand.u32 4294901760, %v1262_v33  ;;  %v3617_v58 = vsub.f32 %v1136_v25, %v3607_v1  ;;  %v785_v10 = vpop.f32.mrf.mxu2 }
 0x151   : > { %v986_v38 = vpop.f32.mrf.mxu0  ;;  %v1071_v26 = vpop.f32.mrf.mxu1 }
 0x152   : > { %v987_v59 = vadd.f32 %v986_v38, %v882_v18  ;;  %v1137_v18 = vld [vmem:[%s4682_s2 + $0x8] sm:$0xff]  ;;  %v4669_v38 = vand.u32 4294901760, %v3571_v43  ;;  %1258 = vmatpush.msra.mxu3 %v1257_v24 }
 0x153   : > { %v3588_v63 = vand.u32 4294901760, %v1137_v18 }
 0x154   : > { %v2808_v14 = vpop.eup %2807  ;;  %v1072_v60 = vadd.f32 %v1071_v26, %v987_v59  ;;  %v1268_v26 = vsub.f32 %v3571_v43, %v4669_v38  ;;  %v1274_v38 = vsub.f32 %v3586_v8, %v1273_v27  ;;  %1264 = vmatpush.msra.mxu3 %v1263_v49 }
 0x155   : > { %2571 = vst [vmem:[%s3386_s11 + $0x40] sm:$0xff] %v2808_v14  ;;  %v3603_v59 = vsub.f32 %v1137_v18, %v3588_v63  ;;  %1181 = vmatpush.msra.mxu2 %v3588_v63  ;;  %v1120_v18 = vadd.f32 %v3527_v57, %v1119_v20  ;;  %v1285_v57 = vand.u32 4294901760, %v3617_v58  ;;  %v781_v20 = vadd.f32 %v780_v53, %v3364_v47 }
 0x156   : > { %2809 = vtanh.f32 %v1072_v60  ;;  %v888_v60 = vadd.f32 %v3514_v7, %v776_v42  ;;  %v1269_v41 = vand.u32 4294901760, %v1268_v26  ;;  %v1275_v33 = vand.u32 4294901760, %v1274_v38 }
 0x157   : > { %v1279_v28 = vand.u32 4294901760, %v3603_v59  ;;  %1183 = vmatpush.msra.mxu2 %v3607_v1  ;;  %v1121_v42 = vadd.f32 %v2808_v14, %v1120_v18  ;;  %v894_v14 = vadd.f32 %v893_v29, %v781_v20  ;;  %v684_v53 = vadd.f32 %v3285_v48, %v3283_v34 }
 0x158   : > { %1270 = vmatpush.msra.mxu3 %v1269_v41  ;;  %v688_v20 = vadd.f32 %v3298_v37, %v3296_v13 }
 0x159   : > { %v990_v16 = vpop.f32.mrf.mxu0  ;;  %v1075_v44 = vpop.f32.mrf.mxu1  ;;  %v1280_v24 = vsub.f32 %v3603_v59, %v1279_v28  ;;  %1296 = vmatpush.msrb.mxu2 %v3379_v4 }
 0x15a   : > { %v991_v7 = vadd.f32 %v990_v16, %v888_v60  ;;  %1276 = vmatpush.msra.mxu3 %v1275_v33  ;;  %v1286_v16 = vsub.f32 %v3617_v58, %v1285_v57  ;;  %v899_v60 = vpop.f32.mrf.mxu3  ;;  %v786_v33 = vadd.f32 %v785_v10, %v684_v53 }
 0x15b   : > { %v1281_v49 = vand.u32 4294901760, %v1280_v24  ;;  %1299 = vmatpush.msrb.mxu2 %v3402_v55  ;;  %v790_v24 = vpop.f32.mrf.mxu2  ;;  %v1507_v55 = vld [vmem:[%s4655_s3 + $0x68] sm:$0xff] }
 0x15c   : > { %v2810_v26 = vpop.eup %2809  ;;  %v1076_v25 = vadd.f32 %v1075_v44, %v991_v7  ;;  %v1287_v41 = vand.u32 4294901760, %v1286_v16  ;;  %v900_v34 = vadd.f32 %v899_v60, %v786_v33  ;;  %v791_v16 = vadd.f32 %v790_v24, %v688_v20 }
 0x15d   : > { %2572 = vst [vmem:[%s3386_s11 + $0x48] sm:$0xff] %v2810_v26  ;;  %v1122_v38 = vadd.f32 %v2810_v26, %v1121_v42  ;;  %1302 = vmatpush.msrb.mxu2 %v3418_v31  ;;  %1282 = vmatpush.msra.mxu3 %v1281_v49 }
 0x15e   : > { %2811 = vtanh.f32 %v1076_v25 }
 0x15f   : > { %1305 = vmatpush.msrb.mxu2 %v3435_v17  ;;  %1288 = vmatpush.msra.mxu3 %v1287_v41 }
 0x161   : > { %v994_v47 = vpop.f32.mrf.mxu0  ;;  %v1079_v44 = vpop.f32.mrf.mxu1  ;;  %1349 = vmatpush.msrb.mxu3 %v3375_v23  ;;  %1308 = vmatpush.msrb.mxu2 %v3451_v0 }
 0x162   : > { %v995_v18 = vadd.f32 %v994_v47, %v894_v14  ;;  %v905_v48 = vpop.f32.mrf.mxu3  ;;  %v692_v47 = vadd.f32 %v3311_v45, %v3309_v22 }
 0x163   : > { %1351 = vmatpush.msrb.mxu3 %v3398_v52  ;;  %1311 = vmatpush.msrb.mxu2 %v3467_v11  ;;  %v795_v41 = vpop.f32.mrf.mxu2  ;;  %v906_v13 = vadd.f32 %v905_v48, %v791_v16 }
 0x164   : > { %v2812_v7 = vpop.eup %2811  ;;  %v1080_v42 = vadd.f32 %v1079_v44, %v995_v18 }
 0x165   : > { %2573 = vst [vmem:[%s3386_s11 + $0x50] sm:$0xff] %v2812_v7  ;;  %v1123_v29 = vadd.f32 %v2812_v7, %v1122_v38  ;;  %1353 = vmatpush.msrb.mxu3 %v3414_v50  ;;  %1314 = vmatpush.msrb.mxu2 %v3485_v62  ;;  %v796_v7 = vadd.f32 %v795_v41, %v692_v47 }
 0x166   : > { %2813 = vtanh.f32 %v1080_v42 }
 0x167   : > { %1355 = vmatpush.msrb.mxu3 %v3430_v2  ;;  %1317 = vmatpush.msrb.mxu2 %v3507_v6 }
 0x169   : > { %v998_v10 = vpop.f32.mrf.mxu0  ;;  %v1083_v26 = vpop.f32.mrf.mxu1  ;;  %1357 = vmatpush.msrb.mxu3 %v3447_v39  ;;  %1320 = vmatpush.msrb.mxu2 %v3519_v35 }
 0x16a   : > { %v999_v25 = vadd.f32 %v998_v10, %v900_v34  ;;  %v911_v53 = vpop.f32.mrf.mxu3 }
 0x16b   : > { %1359 = vmatpush.msrb.mxu3 %v3463_v15  ;;  %1323 = vmatpush.msrb.mxu2 %v3535_v3  ;;  %v912_v22 = vadd.f32 %v911_v53, %v796_v7  ;;  %v800_v45 = vpop.f32.mrf.mxu2 }
 0x16c   : > { %v2814_v49 = vpop.eup %2813  ;;  %v1084_v38 = vadd.f32 %v1083_v26, %v999_v25  ;;  %v801_v48 = vadd.f32 %v800_v45, %v3326_v36 }
 0x16d   : > { %2574 = vst [vmem:[%s3386_s11 + $0x58] sm:$0xff] %v2814_v49  ;;  %v1124_v60 = vadd.f32 %v2814_v49, %v1123_v29  ;;  %1361 = vmatpush.msrb.mxu3 %v3481_v46  ;;  %1326 = vmatpush.msrb.mxu2 %v3549_v30 }
 0x16e   : > { %2815 = vtanh.f32 %v1084_v38 }
 0x16f   : > { %1363 = vmatpush.msrb.mxu3 %v3500_v54  ;;  %1329 = vmatpush.msrb.mxu2 %v3564_v56 }
 0x171   : > { %v1002_v37 = vpop.f32.mrf.mxu0  ;;  %v1087_v14 = vpop.f32.mrf.mxu1  ;;  %1365 = vmatpush.msrb.mxu3 %v3509_v12  ;;  %1332 = vmatpush.msrb.mxu2 %v3571_v43 }
 0x172   : > { %v1003_v44 = vadd.f32 %v1002_v37, %v906_v13  ;;  %v917_v26 = vpop.f32.mrf.mxu3 }
 0x173   : > { %1367 = vmatpush.msrb.mxu3 %v3521_v32  ;;  %1335 = vmatpush.msrb.mxu2 %v3586_v8  ;;  %v918_v20 = vadd.f32 %v917_v26, %v801_v48  ;;  %v1509_v26 = vld [vmem:[%s4655_s3 + $0x78] sm:$0xff] }
 0x174   : > { %v3659_v18 = vpop.eup %2815  ;;  %v1088_v33 = vadd.f32 %v1087_v14, %v1003_v44 }
 0x175   : > { %2575 = vst [vmem:[%s3386_s11 + $0x60] sm:$0xff] %v3659_v18  ;;  %1369 = vmatpush.msrb.mxu3 %v3539_v61  ;;  %1338 = vmatpush.msrb.mxu2 %v3603_v59  ;;  %v1125_v36 = vadd.f32 %v3659_v18, %v1124_v60 }
 0x176   : > { %2817 = vtanh.f32 %v1088_v33 }
 0x177   : > { %1371 = vmatpush.msrb.mxu3 %v3552_v51  ;;  %1341 = vmatpush.msrb.mxu2 %v3617_v58  ;;  %v1500_v58 = vld [vmem:[%s4655_s3 + $0x30] sm:$0xff] }
 0x179   : > { %v1006_v24 = vpop.f32.mrf.mxu0  ;;  %v1091_v42 = vpop.f32.mrf.mxu1  ;;  %1373 = vmatpush.msrb.mxu3 %v3560_v5 }
 0x17a   : > { %v1007_v29 = vadd.f32 %v1006_v24, %v912_v22 }
 0x17b   : > { %1375 = vmatpush.msrb.mxu3 %v3573_v9 }
 0x17c   : > { %v3670_v34 = vpop.eup %2817  ;;  %v1092_v10 = vadd.f32 %v1091_v42, %v1007_v29 }
 0x17d   : > { %2576 = vst [vmem:[%s3386_s11 + $0x68] sm:$0xff] %v3670_v34  ;;  %1377 = vmatpush.msrb.mxu3 %v3588_v63  ;;  %v1126_v13 = vadd.f32 %v3670_v34, %v1125_v36  ;;  %v4686_v36 = vand.u32 4294901760, %v3485_v62 }
 0x17e   : > { %2819 = vtanh.f32 %v1092_v10 }
 0x17f   : > { %1379 = vmatpush.msrb.mxu3 %v3607_v1 }
 0x181   : > { %v1010_v25 = vpop.f32.mrf.mxu0  ;;  %v1095_v49 = vpop.f32.mrf.mxu1 }
 0x182   : > { %v1011_v16 = vadd.f32 %v1010_v25, %v918_v20  ;;  %v4684_v20 = vand.u32 4294901760, %v3451_v0 }
 0x184   : > { %v3678_v38 = vpop.eup %2819  ;;  %v1096_v41 = vadd.f32 %v1095_v49, %v1011_v16  ;;  %v4685_v16 = vand.u32 4294901760, %v3467_v11  ;;  %v1505_v11 = vld [vmem:[%s4655_s3 + $0x58] sm:$0xff] }
 0x185   : > { %2577 = vst [vmem:[%s3386_s11 + $0x70] sm:$0xff] %v3678_v38  ;;  %v1127_v37 = vadd.f32 %v3678_v38, %v1126_v13  ;;  %v3770_v13 = vand.u32 4294901760, %v1505_v11 }
 0x186   : > { %2821 = vtanh.f32 %v1096_v41 }
 0x18c   : > { %v3685_v14 = vpop.eup %2821 }
 0x18d   : > { %2578 = vst [vmem:[%s3386_s11 + $0x78] sm:$0xff] %v3685_v14  ;;  %v1128_v47 = vadd.f32 %v3685_v14, %v1127_v37  ;;  %v4687_v37 = vand.u32 4294901760, %v3507_v6  ;;  %v1504_v6 = vld [vmem:[%s4655_s3 + $0x50] sm:$0xff] }
 0x18f   : > { %v1129_v44 = vrot.slane %v1128_v47, 4 }
 0x191   : > { %v1130_v53 = vadd.f32 %v1129_v44, %v1128_v47  ;;  %v4688_v44 = vand.u32 4294901760, %v3519_v35 }
 0x193   : > { %v1131_v7 = vrot.slane %v1130_v53, 2 }
 0x195   : > { %v1132_v33 = vadd.f32 %v1131_v7, %v1130_v53  ;;  %v3789_v53 = vand.u32 4294901760, %v1504_v6  ;;  %v4689_v7 = vand.u32 4294901760, %v3535_v3  ;;  %v1503_v3 = vld [vmem:[%s4655_s3 + $0x48] sm:$0xff] }
 0x197   : > { %v1133_v22 = vrot.slane %v1132_v33, 1 }
 0x199   : > { %v1134_v45 = vadd.f32 %v1133_v22, %v1132_v33  ;;  %v4690_v22 = vand.u32 4294901760, %v3549_v30 }
 0x19b   : > { %v1135_v24 = vmul.f32 0.125, %v1134_v45  ;;  %v3808_v45 = vand.u32 4294901760, %v1503_v3 }
 0x19d   : > { %v3690_v42 = vand.u32 4294901760, %v1135_v24 }
 0x19f   : > { %v1185_v60 = vsub.f32 %v1135_v24, %v3690_v42  ;;  %1290 = vmatmul.f32.vlgmr.msra.gmra.mxu3 %v3690_v42  ;;  %v4691_v24 = vand.u32 4294901760, %v3564_v56 }
 0x1a0   : > { %1457 = vmatpush.msra.mxu3 %v3375_v23  ;;  %v3704_v23 = vand.u32 4294901760, %v1509_v26 }
 0x1a1   : > { %v1186_v29 = vand.u32 4294901760, %v1185_v60 }
 0x1a2   : > { %1459 = vmatpush.msra.mxu3 %v3398_v52  ;;  %v1508_v52 = vld [vmem:[%s4655_s3 + $0x70] sm:$0xff]  ;;  %1511 = vmatpush.xpose.msra.mxu0 %v3704_v23 }
 0x1a3   : > { %v1187_v48 = vsub.f32 %v1185_v60, %v1186_v29 }
 0x1a4   : > { %1461 = vmatpush.msra.mxu3 %v3414_v50  ;;  %v3709_v50 = vand.u32 4294901760, %v1508_v52 }
 0x1a5   : > { %v1188_v10 = vand.u32 4294901760, %v1187_v48 }
 0x1a6   : > { %1463 = vmatpush.msra.mxu3 %v3430_v2  ;;  %v3715_v2 = vsub.f32 %v1509_v26, %v3704_v23  ;;  %v3719_v4 = vsub.f32 %v1508_v52, %v3709_v50  ;;  %1513 = vmatpush.xpose.msra.mxu0 %v3709_v50  ;;  %v1501_v52 = vld [vmem:[%s4655_s3 + $0x38] sm:$0xff] }
 0x1a7   : > { %1189 = vmatmul.f32.vlgmr.msra.gmra.mxu2 %v1188_v10  ;;  %1383 = vmatmul.f32.vlgmr.msrb.gmra.mxu3 %v1186_v29  ;;  %v4692_v29 = vand.u32 4294901760, %v3571_v43 }
 0x1a8   : > { %1390 = vmatpush.msra.mxu2 %v1195_v21  ;;  %1465 = vmatpush.msra.mxu3 %v3447_v39  ;;  %v1553_v21 = vand.u32 4294901760, %v3715_v2  ;;  %v3729_v39 = vand.u32 4294901760, %v1507_v55 }
 0x1aa   : > { %1394 = vmatpush.msra.mxu2 %v1201_v40  ;;  %1467 = vmatpush.msra.mxu3 %v3463_v15  ;;  %v1559_v40 = vand.u32 4294901760, %v3719_v4  ;;  %v4683_v15 = vand.u32 4294901760, %v3435_v17  ;;  %v1554_v31 = vsub.f32 %v3715_v2, %v1553_v21 }
 0x1ab   : > { %1515 = vmatpush.xpose.msra.mxu0 %v3729_v39 }
 0x1ac   : > { %1398 = vmatpush.msra.mxu2 %v1207_v19  ;;  %1469 = vmatpush.msra.mxu3 %v3481_v46  ;;  %v1560_v19 = vsub.f32 %v3719_v4, %v1559_v40  ;;  %v3741_v46 = vsub.f32 %v1507_v55, %v3729_v39  ;;  %v1555_v17 = vand.u32 4294901760, %v1554_v31 }
 0x1ae   : > { %1402 = vmatpush.msra.mxu2 %v4683_v15  ;;  %1471 = vmatpush.msra.mxu3 %v3500_v54  ;;  %v1506_v54 = vld [vmem:[%s4655_s3 + $0x60] sm:$0xff]  ;;  %v1565_v25 = vand.u32 4294901760, %v3741_v46  ;;  %v1561_v41 = vand.u32 4294901760, %v1560_v19 }
 0x1af   : > { %1344 = vmatmul.f32.vlgmr.msrb.gmra.mxu2 %v1185_v60  ;;  %v3751_v49 = vand.u32 4294901760, %v1506_v54  ;;  %1556 = vmatpush.xpose.msra.mxu1 %v1555_v17  ;;  %v3818_v60 = vsub.f32 %v1503_v3, %v3808_v45 }
 0x1b0   : > { %1406 = vmatpush.msra.mxu2 %v4684_v20  ;;  %1473 = vmatpush.msra.mxu3 %v3509_v12  ;;  %v1566_v0 = vsub.f32 %v3741_v46, %v1565_v25  ;;  %v1499_v20 = vld [vmem:[%s4655_s3 + $0x28] sm:$0xff] }
 0x1b1   : > { %v3760_v12 = vsub.f32 %v1506_v54, %v3751_v49  ;;  %1517 = vmatpush.xpose.msra.mxu0 %v3751_v49  ;;  %v1589_v56 = vand.u32 4294901760, %v3818_v60  ;;  %v3879_v54 = vand.u32 4294901760, %v1499_v20 }
 0x1b2   : > { %1410 = vmatpush.msra.mxu2 %v4685_v16  ;;  %1475 = vmatpush.msra.mxu3 %v3521_v32  ;;  %v1567_v47 = vand.u32 4294901760, %v1566_v0 }
 0x1b3   : > { %v1571_v32 = vand.u32 4294901760, %v3760_v12  ;;  %1562 = vmatpush.xpose.msra.mxu1 %v1561_v41  ;;  %v1590_v43 = vsub.f32 %v3818_v60, %v1589_v56  ;;  %v3885_v0 = vsub.f32 %v1499_v20, %v3879_v54 }
 0x1b4   : > { %1414 = vmatpush.msra.mxu2 %v4686_v36  ;;  %1477 = vmatpush.msra.mxu3 %v3539_v61  ;;  %v3779_v61 = vsub.f32 %v1505_v11, %v3770_v13  ;;  %v1498_v36 = vld [vmem:[%s4655_s3 + $0x20] sm:$0xff] }
 0x1b5   : > { %v1572_v62 = vsub.f32 %v3760_v12, %v1571_v32  ;;  %1519 = vmatpush.xpose.msra.mxu0 %v3770_v13  ;;  %v1591_v59 = vand.u32 4294901760, %v1590_v43  ;;  %v1613_v11 = vand.u32 4294901760, %v3885_v0  ;;  %v1495_v43 = vld [vmem:[%s4655_s3 + $0x8] sm:$0xff] }
 0x1b6   : > { %1418 = vmatpush.msra.mxu2 %v4687_v37  ;;  %1479 = vmatpush.msra.mxu3 %v3552_v51  ;;  %v1577_v51 = vand.u32 4294901760, %v3779_v61  ;;  %v3894_v37 = vand.u32 4294901760, %v1498_v36 }
 0x1b7   : > { %1568 = vmatpush.xpose.msra.mxu1 %v1567_v47  ;;  %v1573_v33 = vand.u32 4294901760, %v1572_v62  ;;  %v1614_v62 = vsub.f32 %v3885_v0, %v1613_v11 }
 0x1b8   : > { %1422 = vmatpush.msra.mxu2 %v4688_v44  ;;  %1481 = vmatpush.msra.mxu3 %v3560_v5  ;;  %v1578_v35 = vsub.f32 %v3779_v61, %v1577_v51  ;;  %v3798_v5 = vsub.f32 %v1504_v6, %v3789_v53  ;;  %v3900_v44 = vsub.f32 %v1498_v36, %v3894_v37  ;;  %v1497_v6 = vld [vmem:[%s4655_s3 + $0x18] sm:$0xff] }
 0x1b9   : > { %1521 = vmatpush.xpose.msra.mxu0 %v3789_v53 }
 0x1ba   : > { %1426 = vmatpush.msra.mxu2 %v4689_v7  ;;  %1483 = vmatpush.msra.mxu3 %v3573_v9  ;;  %v1583_v9 = vand.u32 4294901760, %v3798_v5  ;;  %v1579_v30 = vand.u32 4294901760, %v1578_v35  ;;  %v1619_v7 = vand.u32 4294901760, %v3900_v44  ;;  %v1615_v35 = vand.u32 4294901760, %v1614_v62 }
 0x1bb   : > { %1574 = vmatpush.xpose.msra.mxu1 %v1573_v33  ;;  %v3909_v33 = vand.u32 4294901760, %v1497_v6 }
 0x1bc   : > { %1430 = vmatpush.msra.mxu2 %v4690_v22  ;;  %1485 = vmatpush.msra.mxu3 %v3588_v63  ;;  %v1584_v63 = vsub.f32 %v3798_v5, %v1583_v9  ;;  %v1620_v22 = vsub.f32 %v3900_v44, %v1619_v7 }
 0x1bd   : > { %1523 = vmatpush.xpose.msra.mxu0 %v3808_v45  ;;  %v3915_v3 = vsub.f32 %v1497_v6, %v3909_v33  ;;  %v1871_v6 = vld [vmem:[%s4656_s4 + $0x78] sm:$0xff] }
 0x1be   : > { %1434 = vmatpush.msra.mxu2 %v4691_v24  ;;  %1487 = vmatpush.msra.mxu3 %v3607_v1  ;;  %v1502_v1 = vld [vmem:[%s4655_s3 + $0x40] sm:$0xff]  ;;  %v1585_v10 = vand.u32 4294901760, %v1584_v63  ;;  %v1496_v24 = vld [vmem:[%s4655_s3 + $0x10] sm:$0xff] }
 0x1bf   : > { %1489 = vmatmul.f32.vlgmr.msra.gmra.mxu3 %v3690_v42  ;;  %v3828_v48 = vand.u32 4294901760, %v1502_v1  ;;  %1580 = vmatpush.xpose.msra.mxu1 %v1579_v30  ;;  %v1625_v30 = vand.u32 4294901760, %v3915_v3  ;;  %v3924_v63 = vand.u32 4294901760, %v1496_v24 }
 0x1c0   : > { %1438 = vmatpush.msra.mxu2 %v4692_v29  ;;  %1707 = vmatpush.xpose.msrb.mxu3 %v3704_v23  ;;  %v1621_v29 = vand.u32 4294901760, %v1620_v22 }
 0x1c1   : > { %v3836_v26 = vsub.f32 %v1502_v1, %v3828_v48  ;;  %1525 = vmatpush.xpose.msra.mxu0 %v3828_v48  ;;  %v1626_v1 = vsub.f32 %v3915_v3, %v1625_v30 }
 0x1c2   : > { %1442 = vmatpush.msra.mxu2 %v1273_v27  ;;  %v3846_v27 = vand.u32 4294901760, %v1501_v52 }
 0x1c3   : > { %v1595_v8 = vand.u32 4294901760, %v3836_v26  ;;  %1586 = vmatpush.xpose.msra.mxu1 %v1585_v10  ;;  %v3930_v10 = vsub.f32 %v1496_v24, %v3924_v63  ;;  %v3974_v24 = vand.u32 4294901760, %v1871_v6 }
 0x1c4   : > { %1446 = vmatpush.msra.mxu2 %v1279_v28  ;;  %1709 = vmatpush.xpose.msrb.mxu3 %v3709_v50  ;;  %v3855_v55 = vsub.f32 %v1501_v52, %v3846_v27 }
 0x1c5   : > { %v1596_v28 = vsub.f32 %v3836_v26, %v1595_v8  ;;  %1527 = vmatpush.xpose.msra.mxu0 %v3846_v27  ;;  %v1631_v52 = vand.u32 4294901760, %v3930_v10 }
 0x1c6   : > { %1450 = vmatpush.msra.mxu2 %v1285_v57  ;;  %v1601_v57 = vand.u32 4294901760, %v3855_v55 }
 0x1c7   : > { %1452 = vmatmul.f32.vlgmr.msra.gmra.mxu2 %v3690_v42  ;;  %v3864_v42 = vand.u32 4294901760, %v1500_v58  ;;  %1592 = vmatpush.xpose.msra.mxu1 %v1591_v59  ;;  %v1597_v15 = vand.u32 4294901760, %v1596_v28  ;;  %v3939_v59 = vand.u32 4294901760, %v1495_v43  ;;  %v1627_v28 = vand.u32 4294901760, %v1626_v1 }
 0x1c8   : > { %1654 = vmatpush.xpose.msrb.mxu2 %v3715_v2  ;;  %1711 = vmatpush.xpose.msrb.mxu3 %v3729_v39  ;;  %v1602_v31 = vsub.f32 %v3855_v55, %v1601_v57  ;;  %v3982_v1 = vsub.f32 %v1871_v6, %v3974_v24 }
 0x1c9   : > { %v3870_v19 = vsub.f32 %v1500_v58, %v3864_v42  ;;  %1529 = vmatpush.xpose.msra.mxu0 %v3864_v42  ;;  %v1632_v58 = vsub.f32 %v3930_v10, %v1631_v52 }
 0x1ca   : > { %v1603_v16 = vand.u32 4294901760, %v1602_v31  ;;  %v1494_v31 = vld [vmem:[%s4655_s3] sm:$0xff]  ;;  %v1915_v2 = vand.u32 4294901760, %v3982_v1 }
 0x1cb   : > { %v1607_v17 = vand.u32 4294901760, %v3870_v19  ;;  %1598 = vmatpush.xpose.msra.mxu1 %v1597_v15  ;;  %v3945_v15 = vsub.f32 %v1495_v43, %v3939_v59 }
 0x1cc   : > { %1657 = vmatpush.xpose.msrb.mxu2 %v3719_v4  ;;  %1713 = vmatpush.xpose.msrb.mxu3 %v3751_v49  ;;  %v1870_v4 = vld [vmem:[%s4656_s4 + $0x70] sm:$0xff] }
 0x1cd   : > { %v1608_v41 = vsub.f32 %v3870_v19, %v1607_v17  ;;  %1531 = vmatpush.xpose.msra.mxu0 %v3879_v54  ;;  %v1637_v20 = vand.u32 4294901760, %v3945_v15 }
 0x1cf   : > { %1604 = vmatpush.xpose.msra.mxu1 %v1603_v16  ;;  %v1609_v47 = vand.u32 4294901760, %v1608_v41  ;;  %v3954_v16 = vand.u32 4294901760, %v1494_v31  ;;  %v1633_v41 = vand.u32 4294901760, %v1632_v58  ;;  %v1638_v36 = vsub.f32 %v3945_v15, %v1637_v20 }
 0x1d0   : > { %1660 = vmatpush.xpose.msrb.mxu2 %v3741_v46  ;;  %1715 = vmatpush.xpose.msrb.mxu3 %v3770_v13  ;;  %v1869_v46 = vld [vmem:[%s4656_s4 + $0x68] sm:$0xff] }
 0x1d1   : > { %1533 = vmatpush.xpose.msra.mxu0 %v3894_v37 }
 0x1d3   : > { %1610 = vmatpush.xpose.msra.mxu1 %v1609_v47  ;;  %v3960_v47 = vsub.f32 %v1494_v31, %v3954_v16 }
 0x1d4   : > { %1663 = vmatpush.xpose.msrb.mxu2 %v3760_v12  ;;  %1717 = vmatpush.xpose.msrb.mxu3 %v3789_v53  ;;  %v4019_v12 = vand.u32 4294901760, %v1869_v46 }
 0x1d5   : > { %1535 = vmatpush.xpose.msra.mxu0 %v3909_v33  ;;  %v1643_v62 = vand.u32 4294901760, %v3960_v47 }
 0x1d7   : > { %1616 = vmatpush.xpose.msra.mxu1 %v1615_v35  ;;  %v1639_v35 = vand.u32 4294901760, %v1638_v36  ;;  %v1644_v22 = vsub.f32 %v3960_v47, %v1643_v62 }
 0x1d8   : > { %1666 = vmatpush.xpose.msrb.mxu2 %v3779_v61  ;;  %1719 = vmatpush.xpose.msrb.mxu3 %v3808_v45  ;;  %v1868_v61 = vld [vmem:[%s4656_s4 + $0x60] sm:$0xff] }
 0x1d9   : > { %1537 = vmatpush.xpose.msra.mxu0 %v3924_v63 }
 0x1db   : > { %1622 = vmatpush.xpose.msra.mxu1 %v1621_v29  ;;  %v1645_v29 = vand.u32 4294901760, %v1644_v22 }
 0x1dc   : > { %1669 = vmatpush.xpose.msrb.mxu2 %v3798_v5  ;;  %1721 = vmatpush.xpose.msrb.mxu3 %v3828_v48 }
 0x1dd   : > { %1539 = vmatpush.xpose.msra.mxu0 %v3939_v59 }
 0x1df   : > { %1628 = vmatpush.xpose.msra.mxu1 %v1627_v28  ;;  %v1867_v28 = vld [vmem:[%s4656_s4 + $0x58] sm:$0xff] }
 0x1e0   : > { %1672 = vmatpush.xpose.msrb.mxu2 %v3818_v60  ;;  %1723 = vmatpush.xpose.msrb.mxu3 %v3846_v27 }
 0x1e1   : > { %1541 = vmatpush.xpose.msra.mxu0 %v3954_v16 }
 0x1e3   : > { %1634 = vmatpush.xpose.msra.mxu1 %v1633_v41  ;;  %v1866_v41 = vld [vmem:[%s4656_s4 + $0x50] sm:$0xff] }
 0x1e4   : > { %1675 = vmatpush.xpose.msrb.mxu2 %v3836_v26  ;;  %1725 = vmatpush.xpose.msrb.mxu3 %v3864_v42  ;;  %v4068_v6 = vand.u32 4294901760, %v1866_v41 }
 0x1e5   : > { %1748 = vmatpush.xpose.msrb.mxu0 %v1553_v21  ;;  %v1916_v21 = vsub.f32 %v3982_v1, %v1915_v2 }
 0x1e7   : > { %1640 = vmatpush.xpose.msra.mxu1 %v1639_v35  ;;  %v1865_v35 = vld [vmem:[%s4656_s4 + $0x48] sm:$0xff] }
 0x1e8   : > { %1678 = vmatpush.xpose.msrb.mxu2 %v3855_v55  ;;  %1727 = vmatpush.xpose.msrb.mxu3 %v3879_v54 }
 0x1e9   : > { %1752 = vmatpush.xpose.msrb.mxu0 %v1559_v40  ;;  %v1917_v40 = vand.u32 4294901760, %v1916_v21 }
 0x1eb   : > { %1646 = vmatpush.xpose.msra.mxu1 %v1645_v29  ;;  %v4084_v29 = vand.u32 4294901760, %v1865_v35 }
 0x1ec   : > { %1681 = vmatpush.xpose.msrb.mxu2 %v3870_v19  ;;  %1729 = vmatpush.xpose.msrb.mxu3 %v3894_v37 }
 0x1ed   : > { %1756 = vmatpush.xpose.msrb.mxu0 %v1565_v25 }
 0x1ef   : > { %1815 = vmatpush.xpose.msrb.mxu1 %v3704_v23  ;;  %v4003_v23 = vand.u32 4294901760, %v1870_v4 }
 0x1f0   : > { %1684 = vmatpush.xpose.msrb.mxu2 %v3885_v0  ;;  %1731 = vmatpush.xpose.msrb.mxu3 %v3909_v33 }
 0x1f1   : > { %1760 = vmatpush.xpose.msrb.mxu0 %v1571_v32  ;;  %v4028_v32 = vsub.f32 %v1869_v46, %v4019_v12  ;;  %v1863_v46 = vld [vmem:[%s4656_s4 + $0x38] sm:$0xff] }
 0x1f3   : > { %1817 = vmatpush.xpose.msrb.mxu1 %v3709_v50  ;;  %v4011_v50 = vsub.f32 %v1870_v4, %v4003_v23  ;;  %v1927_v43 = vand.u32 4294901760, %v4028_v32  ;;  %v1864_v4 = vld [vmem:[%s4656_s4 + $0x40] sm:$0xff] }
 0x1f4   : > { %1687 = vmatpush.xpose.msrb.mxu2 %v3900_v44  ;;  %1733 = vmatpush.xpose.msrb.mxu3 %v3924_v63 }
 0x1f5   : > { %1764 = vmatpush.xpose.msrb.mxu0 %v1577_v51  ;;  %v1921_v25 = vand.u32 4294901760, %v4011_v50  ;;  %v1928_v5 = vsub.f32 %v4028_v32, %v1927_v43 }
 0x1f7   : > { %1819 = vmatpush.xpose.msrb.mxu1 %v3729_v39  ;;  %v1922_v39 = vsub.f32 %v4011_v50, %v1921_v25 }
 0x1f8   : > { %1690 = vmatpush.xpose.msrb.mxu2 %v3915_v3  ;;  %1735 = vmatpush.xpose.msrb.mxu3 %v3939_v59 }
 0x1f9   : > { %1768 = vmatpush.xpose.msrb.mxu0 %v1583_v9  ;;  %v1923_v51 = vand.u32 4294901760, %v1922_v39  ;;  %v4114_v39 = vand.u32 4294901760, %v1863_v46 }
 0x1fb   : > { %1821 = vmatpush.xpose.msrb.mxu1 %v3751_v49  ;;  %v4035_v49 = vand.u32 4294901760, %v1868_v61 }
 0x1fc   : > { %1693 = vmatpush.xpose.msrb.mxu2 %v3930_v10  ;;  %1737 = vmatpush.xpose.msrb.mxu3 %v3954_v16 }
 0x1fd   : > { %1772 = vmatpush.xpose.msrb.mxu0 %v1589_v56  ;;  %v4044_v9 = vsub.f32 %v1868_v61, %v4035_v49  ;;  %v4052_v56 = vand.u32 4294901760, %v1867_v28  ;;  %v4123_v61 = vsub.f32 %v1863_v46, %v4114_v39 }
 0x1ff   : > { %1823 = vmatpush.xpose.msrb.mxu1 %v3770_v13  ;;  %v1929_v13 = vand.u32 4294901760, %v1928_v5  ;;  %v1933_v60 = vand.u32 4294901760, %v4044_v9  ;;  %v4061_v31 = vsub.f32 %v1867_v28, %v4052_v56  ;;  %v1963_v28 = vand.u32 4294901760, %v4123_v61 }
 0x200   : > { %1918 = vmatpush.xpose.msra.mxu3 %v1917_v40  ;;  %1696 = vmatpush.xpose.msrb.mxu2 %v3945_v15  ;;  %v4100_v40 = vand.u32 4294901760, %v1864_v4 }
 0x201   : > { %1776 = vmatpush.xpose.msrb.mxu0 %v1595_v8  ;;  %v1934_v58 = vsub.f32 %v4044_v9, %v1933_v60  ;;  %v4077_v8 = vsub.f32 %v1866_v41, %v4068_v6 }
 0x203   : > { %1825 = vmatpush.xpose.msrb.mxu1 %v3789_v53  ;;  %v1935_v36 = vand.u32 4294901760, %v1934_v58  ;;  %v1939_v53 = vand.u32 4294901760, %v4061_v31  ;;  %v1861_v58 = vld [vmem:[%s4656_s4 + $0x28] sm:$0xff] }
 0x204   : > { %1924 = vmatpush.xpose.msra.mxu3 %v1923_v51  ;;  %1699 = vmatpush.xpose.msrb.mxu2 %v3960_v47  ;;  %v4148_v41 = vand.u32 4294901760, %v1861_v58 }
 0x205   : > { %1780 = vmatpush.xpose.msrb.mxu0 %v1601_v57  ;;  %v1940_v26 = vsub.f32 %v4061_v31, %v1939_v53  ;;  %v4093_v57 = vsub.f32 %v1865_v35, %v4084_v29 }
 0x207   : > { %1827 = vmatpush.xpose.msrb.mxu1 %v3808_v45  ;;  %v1941_v22 = vand.u32 4294901760, %v1940_v26  ;;  %v1945_v45 = vand.u32 4294901760, %v4077_v8 }
 0x208   : > { %1873 = vmatpush.xpose.msra.mxu2 %v3974_v24  ;;  %1930 = vmatpush.xpose.msra.mxu3 %v1929_v13 }
 0x209   : > { %1784 = vmatpush.xpose.msrb.mxu0 %v1607_v17  ;;  %v1946_v55 = vsub.f32 %v4077_v8, %v1945_v45  ;;  %v4109_v17 = vsub.f32 %v1864_v4, %v4100_v40 }
 0x20b   : > { %1829 = vmatpush.xpose.msrb.mxu1 %v3828_v48  ;;  %v1947_v21 = vand.u32 4294901760, %v1946_v55  ;;  %v1951_v48 = vand.u32 4294901760, %v4093_v57 }
 0x20c   : > { %1875 = vmatpush.xpose.msra.mxu2 %v4003_v23  ;;  %1936 = vmatpush.xpose.msra.mxu3 %v1935_v36  ;;  %v1860_v36 = vld [vmem:[%s4656_s4 + $0x20] sm:$0xff] }
 0x20d   : > { %1788 = vmatpush.xpose.msrb.mxu0 %v1613_v11  ;;  %v1952_v19 = vsub.f32 %v4093_v57, %v1951_v48  ;;  %v1957_v11 = vand.u32 4294901760, %v4109_v17  ;;  %v4164_v35 = vand.u32 4294901760, %v1860_v36 }
 0x20f   : > { %1831 = vmatpush.xpose.msrb.mxu1 %v3846_v27  ;;  %v1862_v27 = vld [vmem:[%s4656_s4 + $0x30] sm:$0xff]  ;;  %v1953_v0 = vand.u32 4294901760, %v1952_v19  ;;  %v1958_v51 = vsub.f32 %v4109_v17, %v1957_v11 }
 0x210   : > { %1877 = vmatpush.xpose.msra.mxu2 %v4019_v12  ;;  %1942 = vmatpush.xpose.msra.mxu3 %v1941_v22  ;;  %v4130_v5 = vand.u32 4294901760, %v1862_v27  ;;  %v1859_v22 = vld [vmem:[%s4656_s4 + $0x18] sm:$0xff] }
 0x211   : > { %1792 = vmatpush.xpose.msrb.mxu0 %v1619_v7  ;;  %v1959_v13 = vand.u32 4294901760, %v1958_v51  ;;  %v4180_v4 = vand.u32 4294901760, %v1859_v22 }
 0x212   : > { %v4141_v44 = vsub.f32 %v1862_v27, %v4130_v5  ;;  %v1857_v27 = vld [vmem:[%s4656_s4 + $0x8] sm:$0xff] }
 0x213   : > { %1833 = vmatpush.xpose.msrb.mxu1 %v3864_v42  ;;  %v1964_v42 = vsub.f32 %v4123_v61, %v1963_v28 }
 0x214   : > { %1879 = vmatpush.xpose.msra.mxu2 %v4035_v49  ;;  %1948 = vmatpush.xpose.msra.mxu3 %v1947_v21  ;;  %v1858_v21 = vld [vmem:[%s4656_s4 + $0x10] sm:$0xff] }
 0x215   : > { %1796 = vmatpush.xpose.msrb.mxu0 %v1625_v30  ;;  %v1965_v7 = vand.u32 4294901760, %v1964_v42  ;;  %v4157_v30 = vsub.f32 %v1861_v58, %v4148_v41  ;;  %v4196_v46 = vand.u32 4294901760, %v1858_v21 }
 0x217   : > { %1835 = vmatpush.xpose.msrb.mxu1 %v3879_v54  ;;  %v1969_v54 = vand.u32 4294901760, %v4141_v44 }
 0x218   : > { %1881 = vmatpush.xpose.msra.mxu2 %v4052_v56  ;;  %1954 = vmatpush.xpose.msra.mxu3 %v1953_v0 }
 0x219   : > { %1800 = vmatpush.xpose.msrb.mxu0 %v1631_v52  ;;  %v1970_v3 = vsub.f32 %v4141_v44, %v1969_v54  ;;  %v4173_v52 = vsub.f32 %v1860_v36, %v4164_v35 }
 0x21b   : > { %1837 = vmatpush.xpose.msrb.mxu1 %v3894_v37  ;;  %v1971_v26 = vand.u32 4294901760, %v1970_v3  ;;  %v1975_v37 = vand.u32 4294901760, %v4157_v30  ;;  %v1856_v3 = vld [vmem:[%s4656_s4] sm:$0xff] }
 0x21c   : > { %1883 = vmatpush.xpose.msra.mxu2 %v4068_v6  ;;  %1960 = vmatpush.xpose.msra.mxu3 %v1959_v13  ;;  %v4210_v13 = vand.u32 4294901760, %v1857_v27  ;;  %v4224_v36 = vand.u32 4294901760, %v1856_v3 }
 0x21d   : > { %1804 = vmatpush.xpose.msrb.mxu0 %v1637_v20  ;;  %v1976_v10 = vsub.f32 %v4157_v30, %v1975_v37  ;;  %v4189_v20 = vsub.f32 %v1859_v22, %v4180_v4 }
 0x21e   : > { %v4217_v42 = vsub.f32 %v1857_v27, %v4210_v13 }
 0x21f   : > { %1839 = vmatpush.xpose.msrb.mxu1 %v3909_v33  ;;  %v1977_v55 = vand.u32 4294901760, %v1976_v10  ;;  %v1981_v33 = vand.u32 4294901760, %v4173_v52 }
 0x220   : > { %1885 = vmatpush.xpose.msra.mxu2 %v4084_v29  ;;  %1966 = vmatpush.xpose.msra.mxu3 %v1965_v7  ;;  %v4673_v58 = vand.u32 4294901760, %v4217_v42 }
 0x221   : > { %1808 = vmatpush.xpose.msrb.mxu0 %v1643_v62  ;;  %v1982_v15 = vsub.f32 %v4173_v52, %v1981_v33  ;;  %v4203_v62 = vsub.f32 %v1858_v21, %v4196_v46 }
 0x222   : > { %v1291_v21 = vpop.f32.mrf.mxu3 }
 0x223   : > { %1841 = vmatpush.xpose.msrb.mxu1 %v3924_v63  ;;  %v1983_v19 = vand.u32 4294901760, %v1982_v15  ;;  %v1987_v63 = vand.u32 4294901760, %v4189_v20  ;;  %v1993_v51 = vand.u32 4294901760, %v4203_v62 }
 0x224   : > { %1887 = vmatpush.xpose.msra.mxu2 %v4100_v40  ;;  %1972 = vmatpush.xpose.msra.mxu3 %v1971_v26  ;;  %v4230_v26 = vsub.f32 %v1856_v3, %v4224_v36 }
 0x225   : > { %v1988_v47 = vsub.f32 %v4189_v20, %v1987_v63 }
 0x226   : > { %v4674_v22 = vand.u32 4294901760, %v4230_v26 }
 0x227   : > { %1843 = vmatpush.xpose.msrb.mxu1 %v3939_v59  ;;  %v1989_v0 = vand.u32 4294901760, %v1988_v47  ;;  %v1994_v59 = vsub.f32 %v4203_v62, %v1993_v51 }
 0x228   : > { %1889 = vmatpush.xpose.msra.mxu2 %v4114_v39  ;;  %1978 = vmatpush.xpose.msra.mxu3 %v1977_v55  ;;  %v2006_v15 = vsub.f32 %v4230_v26, %v4674_v22 }
 0x229   : > { %v1995_v7 = vand.u32 4294901760, %v1994_v59 }
 0x22a   : > { %v1190_v55 = vpop.f32.mrf.mxu2 }
 0x22b   : > { %1845 = vmatpush.xpose.msrb.mxu1 %v3954_v16  ;;  %v2000_v16 = vsub.f32 %v4217_v42, %v4673_v58  ;;  %v1292_v27 = vadd.f32 %v1291_v21, %v1190_v55 }
 0x22c   : > { %1891 = vmatpush.xpose.msra.mxu2 %v4130_v5  ;;  %1984 = vmatpush.xpose.msra.mxu3 %v1983_v19  ;;  %v2007_v19 = vand.u32 4294901760, %v2006_v15 }
 0x22d   : > { %v2001_v10 = vand.u32 4294901760, %v2000_v16 }
 0x230   : > { %1893 = vmatpush.xpose.msra.mxu2 %v4148_v41  ;;  %1990 = vmatpush.xpose.msra.mxu3 %v1989_v0  ;;  %v1384_v0 = vpop.f32.mrf.mxu3 }
 0x232   : > { %v1345_v47 = vpop.f32.mrf.mxu2 }
 0x233   : > { %v1346_v59 = vadd.f32 %v1345_v47, %v1292_v27  ;;  %v2833_v47 = vld [vmem:[%s3386_s11 + $0x30] sm:$0xff] }
 0x234   : > { %1895 = vmatpush.xpose.msra.mxu2 %v4164_v35  ;;  %1996 = vmatpush.xpose.msra.mxu3 %v1995_v7  ;;  %v4436_v27 = vand.u32 4294901760, %v2833_v47 }
 0x235   : > { %v1385_v7 = vadd.f32 %v1384_v0, %v1346_v59 }
 0x238   : > { %1897 = vmatpush.xpose.msra.mxu2 %v4180_v4  ;;  %2002 = vmatpush.xpose.msra.mxu3 %v2001_v10 }
 0x23c   : > { %1899 = vmatpush.xpose.msra.mxu2 %v4196_v46  ;;  %2008 = vmatpush.xpose.msra.mxu3 %v2007_v19 }
 0x240   : > { %1901 = vmatpush.xpose.msra.mxu2 %v4210_v13 }
 0x242   : > { %v1490_v10 = vpop.f32.mrf.mxu3 }
 0x244   : > { %1903 = vmatpush.xpose.msra.mxu2 %v4224_v36 }
 0x24a   : > { %v1453_v3 = vpop.f32.mrf.mxu2 }
 0x24b   : > { %v1454_v16 = vadd.f32 %v1453_v3, %v1385_v7 }
 0x24d   : > { %v1491_v58 = vadd.f32 %v1490_v10, %v1454_v16  ;;  %v2834_v16 = vld [vmem:[%s3386_s11 + $0x28] sm:$0xff] }
 0x24e   : > { %v4449_v10 = vand.u32 4294901760, %v2834_v16 }
 0x24f   : > { %2823 = vtanh.f32 %v1491_v58 }
 0x255   : > { %v2824_v15 = vpop.eup %2823 }
 0x256   : > { %v1542_v19 = vand.u32 4294901760, %v2824_v15  ;;  %2579 = vst [vmem:[%s368_s26] sm:$0x1] %v2824_v15 }
 0x258   : > { %1648 = vmatmul.f32.vlgmr.msra.gmra.mxu1 %v1542_v19  ;;  %v1543_v22 = vsub.f32 %v2824_v15, %v1542_v19 }
 0x259   : > { %2069 = vmatpush.xpose.msra.mxu1 %v3974_v24 }
 0x25a   : > { %1702 = vmatmul.f32.vlgmr.msrb.gmra.mxu2 %v1543_v22  ;;  %v1544_v55 = vand.u32 4294901760, %v1543_v22 }
 0x25b   : > { %2110 = vmatpush.xpose.msrb.mxu2 %v1915_v2  ;;  %v1851_v2 = vld [vmem:[%s4658_s6] sm:$0x1] }
 0x25c   : > { %v1545_v21 = vsub.f32 %v1543_v22, %v1544_v55  ;;  %1741 = vmatmul.f32.vlgmr.msrb.gmra.mxu3 %v1544_v55  ;;  %2825 = vtanh.f32 %v1851_v2 }
 0x25d   : > { %2071 = vmatpush.xpose.msra.mxu1 %v4003_v23  ;;  %2177 = vmatpush.xpose.msrb.mxu3 %v3974_v24 }
 0x25e   : > { %v1546_v58 = vand.u32 4294901760, %v1545_v21  ;;  %v4457_v21 = vsub.f32 %v2833_v47, %v4436_v27 }
 0x25f   : > { %2114 = vmatpush.xpose.msrb.mxu2 %v1921_v25 }
 0x260   : > { %1547 = vmatmul.f32.vlgmr.msra.gmra.mxu0 %v1546_v58  ;;  %1847 = vmatmul.f32.vlgmr.msrb.gmra.mxu1 %v1542_v19  ;;  %v2835_v58 = vld [vmem:[%s3386_s11 + $0x20] sm:$0xff] }
 0x261   : > { %2016 = vmatpush.xpose.msra.mxu0 %v3982_v1  ;;  %2073 = vmatpush.xpose.msra.mxu1 %v4019_v12  ;;  %v4462_v2 = vand.u32 4294901760, %v2835_v58 }
 0x262   : > { %2179 = vmatpush.xpose.msrb.mxu3 %v4003_v23  ;;  %v2826_v24 = vpop.eup %2825 }
 0x263   : > { %2118 = vmatpush.xpose.msrb.mxu2 %v1927_v43  ;;  %v1854_v1 = vperm.slane %v2826_v24, 0  ;;  %v4312_v43 = vand.u32 4294901760, %v3685_v14 }
 0x265   : > { %2019 = vmatpush.xpose.msra.mxu0 %v4011_v50  ;;  %2075 = vmatpush.xpose.msra.mxu1 %v4035_v49  ;;  %v4273_v23 = vand.u32 4294901760, %v1854_v1 }
 0x266   : > { %2181 = vmatpush.xpose.msrb.mxu3 %v4019_v12 }
 0x267   : > { %2122 = vmatpush.xpose.msrb.mxu2 %v1933_v60  ;;  %v4279_v50 = vsub.f32 %v1854_v1, %v4273_v23  ;;  %2010 = vmatmul.f32.vlgmr.msra.gmra.mxu3 %v4273_v23 }
 0x268   : > { %1810 = vmatmul.f32.vlgmr.msrb.gmra.mxu0 %v1542_v19 }
 0x269   : > { %2022 = vmatpush.xpose.msra.mxu0 %v4028_v32  ;;  %2077 = vmatpush.xpose.msra.mxu1 %v4052_v56  ;;  %v1906_v25 = vand.u32 4294901760, %v4279_v50 }
 0x26a   : > { %2183 = vmatpush.xpose.msrb.mxu3 %v4035_v49  ;;  %v4321_v49 = vsub.f32 %v3685_v14, %v4312_v43  ;;  %v4337_v14 = vand.u32 4294901760, %v3670_v34 }
 0x26b   : > { %2126 = vmatpush.xpose.msrb.mxu2 %v1939_v53  ;;  %v1907_v12 = vsub.f32 %v4279_v50, %v1906_v25 }
 0x26c   : > { %v2262_v60 = vand.u32 4294901760, %v4321_v49  ;;  %v4350_v53 = vsub.f32 %v3670_v34, %v4337_v14 }
 0x26d   : > { %2025 = vmatpush.xpose.msra.mxu0 %v4044_v9  ;;  %2079 = vmatpush.xpose.msra.mxu1 %v4068_v6  ;;  %v1908_v32 = vand.u32 4294901760, %v1907_v12  ;;  %v4324_v9 = vand.u32 4294901760, %v3678_v38 }
 0x26e   : > { %2185 = vmatpush.xpose.msrb.mxu3 %v4052_v56 }
 0x26f   : > { %2130 = vmatpush.xpose.msrb.mxu2 %v1945_v45  ;;  %v4334_v56 = vsub.f32 %v3678_v38, %v4324_v9  ;;  %v2827_v45 = vld [vmem:[%s3386_s11 + $0x58] sm:$0xff] }
 0x270   : > { %1909 = vmatmul.f32.vlgmr.msra.gmra.mxu2 %v1908_v32 }
 0x271   : > { %2028 = vmatpush.xpose.msra.mxu0 %v4061_v31  ;;  %2081 = vmatpush.xpose.msra.mxu1 %v4084_v29  ;;  %v2263_v31 = vsub.f32 %v4321_v49, %v2262_v60  ;;  %v2268_v38 = vand.u32 4294901760, %v4334_v56 }
 0x272   : > { %2187 = vmatpush.xpose.msrb.mxu3 %v4068_v6  ;;  %v4353_v6 = vand.u32 4294901760, %v3659_v18  ;;  %v2274_v18 = vand.u32 4294901760, %v4350_v53 }
 0x273   : > { %2134 = vmatpush.xpose.msrb.mxu2 %v1951_v48  ;;  %v2269_v34 = vsub.f32 %v4334_v56, %v2268_v38  ;;  %v2828_v48 = vld [vmem:[%s3386_s11 + $0x60] sm:$0xff] }
 0x275   : > { %2031 = vmatpush.xpose.msra.mxu0 %v4077_v8  ;;  %2083 = vmatpush.xpose.msra.mxu1 %v4100_v40  ;;  %v4693_v8 = vand.u32 4294901760, %v4217_v42 }
 0x276   : > { %2189 = vmatpush.xpose.msrb.mxu3 %v4084_v29  ;;  %v4361_v29 = vand.u32 4294901760, %v2827_v45 }
 0x277   : > { %2138 = vmatpush.xpose.msrb.mxu2 %v1957_v11 }
 0x279   : > { %2034 = vmatpush.xpose.msra.mxu0 %v4093_v57  ;;  %2085 = vmatpush.xpose.msra.mxu1 %v4114_v39  ;;  %v2264_v57 = vand.u32 4294901760, %v2263_v31 }
 0x27a   : > { %2191 = vmatpush.xpose.msrb.mxu3 %v4100_v40  ;;  %v4369_v40 = vsub.f32 %v2828_v48, %v4353_v6 }
 0x27b   : > { %2142 = vmatpush.xpose.msrb.mxu2 %v1963_v28 }
 0x27c   : > { %v2280_v28 = vand.u32 4294901760, %v4369_v40 }
 0x27d   : > { %2037 = vmatpush.xpose.msra.mxu0 %v4109_v17  ;;  %2087 = vmatpush.xpose.msra.mxu1 %v4130_v5  ;;  %v4694_v17 = vand.u32 4294901760, %v4230_v26 }
 0x27e   : > { %2193 = vmatpush.xpose.msrb.mxu3 %v4114_v39  ;;  %v2829_v39 = vld [vmem:[%s3386_s11 + $0x50] sm:$0xff] }
 0x27f   : > { %2146 = vmatpush.xpose.msrb.mxu2 %v1969_v54  ;;  %v4377_v11 = vand.u32 4294901760, %v2829_v39  ;;  %v2830_v54 = vld [vmem:[%s3386_s11 + $0x48] sm:$0xff] }
 0x281   : > { %2040 = vmatpush.xpose.msra.mxu0 %v4123_v61  ;;  %2089 = vmatpush.xpose.msra.mxu1 %v4148_v41  ;;  %v2270_v61 = vand.u32 4294901760, %v2269_v34 }
 0x282   : > { %2195 = vmatpush.xpose.msrb.mxu3 %v4130_v5  ;;  %v2275_v5 = vsub.f32 %v4350_v53, %v2274_v18 }
 0x283   : > { %2150 = vmatpush.xpose.msrb.mxu2 %v1975_v37  ;;  %v2281_v37 = vsub.f32 %v4369_v40, %v2280_v28 }
 0x285   : > { %2043 = vmatpush.xpose.msra.mxu0 %v4141_v44  ;;  %2091 = vmatpush.xpose.msra.mxu1 %v4164_v35  ;;  %v4387_v44 = vsub.f32 %v2827_v45, %v4361_v29  ;;  %v4483_v45 = vsub.f32 %v2835_v58, %v4462_v2 }
 0x286   : > { %2197 = vmatpush.xpose.msrb.mxu3 %v4148_v41  ;;  %v4394_v41 = vand.u32 4294901760, %v2830_v54 }
 0x287   : > { %2154 = vmatpush.xpose.msrb.mxu2 %v1981_v33  ;;  %v2831_v33 = vld [vmem:[%s3386_s11 + $0x40] sm:$0xff] }
 0x289   : > { %2046 = vmatpush.xpose.msra.mxu0 %v4157_v30  ;;  %2093 = vmatpush.xpose.msra.mxu1 %v4180_v4  ;;  %v2276_v30 = vand.u32 4294901760, %v2275_v5  ;;  %v2838_v5 = vld [vmem:[%s3386_s11 + $0x8] sm:$0xff] }
 0x28a   : > { %2199 = vmatpush.xpose.msrb.mxu3 %v4164_v35  ;;  %v2286_v35 = vand.u32 4294901760, %v4387_v44 }
 0x28b   : > { %2158 = vmatpush.xpose.msrb.mxu2 %v1987_v63 }
 0x28c   : > { %v2287_v63 = vsub.f32 %v4387_v44, %v2286_v35 }
 0x28d   : > { %2049 = vmatpush.xpose.msra.mxu0 %v4173_v52  ;;  %2095 = vmatpush.xpose.msra.mxu1 %v4196_v46  ;;  %v4402_v52 = vsub.f32 %v2829_v39, %v4377_v11  ;;  %v2328_v39 = vand.u32 4294901760, %v4483_v45 }
 0x28e   : > { %2201 = vmatpush.xpose.msrb.mxu3 %v4180_v4  ;;  %v4409_v4 = vand.u32 4294901760, %v2831_v33 }
 0x28f   : > { %2162 = vmatpush.xpose.msrb.mxu2 %v1993_v51  ;;  %v2832_v51 = vld [vmem:[%s3386_s11 + $0x38] sm:$0xff] }
 0x290   : > { %v4431_v22 = vsub.f32 %v2831_v33, %v4409_v4 }
 0x291   : > { %2052 = vmatpush.xpose.msra.mxu0 %v4189_v20  ;;  %2097 = vmatpush.xpose.msra.mxu1 %v4210_v13  ;;  %v2282_v20 = vand.u32 4294901760, %v2281_v37  ;;  %v2329_v37 = vsub.f32 %v4483_v45, %v2328_v39 }
 0x292   : > { %2203 = vmatpush.xpose.msrb.mxu3 %v4196_v46  ;;  %v2292_v46 = vand.u32 4294901760, %v4402_v52  ;;  %v2304_v7 = vand.u32 4294901760, %v4431_v22 }
 0x293   : > { %2166 = vmatpush.xpose.msrb.mxu2 %v4693_v8 }
 0x294   : > { %v2305_v19 = vsub.f32 %v4431_v22, %v2304_v7 }
 0x295   : > { %2055 = vmatpush.xpose.msra.mxu0 %v4203_v62  ;;  %2099 = vmatpush.xpose.msra.mxu1 %v4224_v36  ;;  %v4418_v62 = vsub.f32 %v2830_v54, %v4394_v41  ;;  %v4501_v54 = vand.u32 4294901760, %v2838_v5 }
 0x296   : > { %2205 = vmatpush.xpose.msrb.mxu3 %v4210_v13  ;;  %v4423_v13 = vand.u32 4294901760, %v2832_v51  ;;  %v2306_v24 = vand.u32 4294901760, %v2305_v19 }
 0x297   : > { %2170 = vmatpush.xpose.msrb.mxu2 %v4694_v17 }
 0x298   : > { %2103 = vmatmul.f32.vlgmr.msra.gmra.mxu1 %v1906_v25  ;;  %v4444_v3 = vsub.f32 %v2832_v51, %v4423_v13  ;;  %v2836_v25 = vld [vmem:[%s3386_s11 + $0x18] sm:$0xff] }
 0x299   : > { %2265 = vmatpush.xpose.msrb.mxu1 %v2264_v57  ;;  %2058 = vmatpush.xpose.msra.mxu0 %v4217_v42  ;;  %v2288_v42 = vand.u32 4294901760, %v2287_v63  ;;  %v4475_v12 = vand.u32 4294901760, %v2836_v25  ;;  %v2837_v57 = vld [vmem:[%s3386_s11 + $0x10] sm:$0xff]  ;;  %v2839_v63 = vld [vmem:[%s3386_s11] sm:$0xff]  ;;  %s2856_s11 = scalar_lea.hbm %s2855_s28, 1 }
 0x29a   : > { %2207 = vmatpush.xpose.msrb.mxu3 %v4224_v36  ;;  %2172 = vmatmul.f32.vlgmr.msrb.gmra.mxu2 %v4273_v23  ;;  %v2293_v36 = vsub.f32 %v4402_v52, %v2292_v46  ;;  %v2310_v55 = vand.u32 4294901760, %v4444_v3  ;;  %v4488_v34 = vand.u32 4294901760, %v2837_v57  ;;  %v4514_v51 = vand.u32 4294901760, %v2839_v63  ;;  %p2857_p11 = scmp.ne.s32.totalorder %s2855_s28, %s2856_s11  ;;  %p2862_p1 = scmp.lt.s32.totalorder %s2860_s1, %s2856_s11 }
 0x29b   : > { %2363 = vmatpush.xpose.msra.mxu2 %v4321_v49 }
 0x29c   : > { %v2294_v0 = vand.u32 4294901760, %v2293_v36  ;;  %v2311_v1 = vsub.f32 %v4444_v3, %v2310_v55  ;;  %v4532_v19 = vsub.f32 %v2839_v63, %v4514_v51  ;;  %p2858_p12 = pnand %p2857_p11, %p3029_p5  ;;  %p2863_p2 = por %p2862_p1, %p2861_p0 }
 0x29d   : > { %2271 = vmatpush.xpose.msrb.mxu1 %v2270_v61  ;;  %2061 = vmatpush.xpose.msra.mxu0 %v4230_v26  ;;  %v2298_v26 = vand.u32 4294901760, %v4418_v62  ;;  %v4496_v61 = vsub.f32 %v2836_v25, %v4475_v12 }
 0x29e   : > { %2416 = vmatpush.xpose.msra.mxu3 %v4312_v43  ;;  %v2312_v32 = vand.u32 4294901760, %v2311_v1  ;;  %v2352_v1 = vand.u32 4294901760, %v4532_v19  ;;  %p2859_p13 = pneg %p2858_p12 }
 0x29f   : > { %2366 = vmatpush.xpose.msra.mxu2 %v4334_v56  ;;  %2209 = vmatmul.f32.vlgmr.msrb.gmra.mxu3 %v4273_v23  ;;  %v2299_v59 = vsub.f32 %v4418_v62, %v2298_v26  ;;  %v2316_v23 = vand.u32 4294901760, %v4457_v21  ;;  %v2334_v33 = vand.u32 4294901760, %v4496_v61 }
 0x2a0   : > { %2064 = vmatmul.f32.vlgmr.msra.gmra.mxu0 %v4279_v50  ;;  %v4470_v50 = vsub.f32 %v2834_v16, %v4449_v10  ;;  %p2864_p3 = pnand %p2863_p2, %p2859_p13 }
 0x2a1   : > { %2220 = vmatpush.xpose.msrb.mxu0 %v4312_v43  ;;  %2277 = vmatpush.xpose.msrb.mxu1 %v2276_v30  ;;  %v2300_v15 = vand.u32 4294901760, %v2299_v59  ;;  %v2317_v31 = vsub.f32 %v4457_v21, %v2316_v23  ;;  %v2335_v36 = vsub.f32 %v4496_v61, %v2334_v33 }
 0x2a2   : > { %2418 = vmatpush.xpose.msra.mxu3 %v4324_v9  ;;  %v2322_v8 = vand.u32 4294901760, %v4470_v50 }
 0x2a3   : > { %2369 = vmatpush.xpose.msra.mxu2 %v4350_v53  ;;  %v2318_v48 = vand.u32 4294901760, %v2317_v31  ;;  %v2336_v59 = vand.u32 4294901760, %v2335_v36 }
 0x2a4   : > { %v2323_v17 = vsub.f32 %v4470_v50, %v2322_v8 }
 0x2a5   : > { %2222 = vmatpush.xpose.msrb.mxu0 %v4324_v9  ;;  %2283 = vmatpush.xpose.msrb.mxu1 %v2282_v20  ;;  %v4509_v20 = vsub.f32 %v2837_v57, %v4488_v34 }
 0x2a6   : > { %2420 = vmatpush.xpose.msra.mxu3 %v4337_v14  ;;  %v2324_v30 = vand.u32 4294901760, %v2323_v17 }
 0x2a7   : > { %2372 = vmatpush.xpose.msra.mxu2 %v4369_v40  ;;  %v2340_v47 = vand.u32 4294901760, %v4509_v20 }
 0x2a9   : > { %2224 = vmatpush.xpose.msrb.mxu0 %v4337_v14  ;;  %2289 = vmatpush.xpose.msrb.mxu1 %v2288_v42  ;;  %v2330_v42 = vand.u32 4294901760, %v2329_v37  ;;  %v2341_v16 = vsub.f32 %v4509_v20, %v2340_v47 }
 0x2aa   : > { %2422 = vmatpush.xpose.msra.mxu3 %v4353_v6 }
 0x2ab   : > { %2375 = vmatpush.xpose.msra.mxu2 %v4387_v44  ;;  %v2342_v58 = vand.u32 4294901760, %v2341_v16 }
 0x2ad   : > { %2226 = vmatpush.xpose.msrb.mxu0 %v4353_v6  ;;  %2295 = vmatpush.xpose.msrb.mxu1 %v2294_v0  ;;  %v4522_v0 = vsub.f32 %v2838_v5, %v4501_v54 }
 0x2ae   : > { %2424 = vmatpush.xpose.msra.mxu3 %v4361_v29 }
 0x2af   : > { %2378 = vmatpush.xpose.msra.mxu2 %v4402_v52 }
 0x2b1   : > { %2228 = vmatpush.xpose.msrb.mxu0 %v4361_v29  ;;  %2301 = vmatpush.xpose.msrb.mxu1 %v2300_v15  ;;  %v2346_v15 = vand.u32 4294901760, %v4522_v0 }
 0x2b2   : > { %2426 = vmatpush.xpose.msra.mxu3 %v4377_v11 }
 0x2b3   : > { %2381 = vmatpush.xpose.msra.mxu2 %v4418_v62 }
 0x2b5   : > { %2230 = vmatpush.xpose.msrb.mxu0 %v4377_v11  ;;  %2307 = vmatpush.xpose.msrb.mxu1 %v2306_v24  ;;  %v2347_v24 = vsub.f32 %v4522_v0, %v2346_v15 }
 0x2b6   : > { %2428 = vmatpush.xpose.msra.mxu3 %v4394_v41 }
 0x2b7   : > { %2384 = vmatpush.xpose.msra.mxu2 %v4431_v22  ;;  %v2348_v25 = vand.u32 4294901760, %v2347_v24 }
 0x2b9   : > { %2232 = vmatpush.xpose.msrb.mxu0 %v4394_v41  ;;  %2313 = vmatpush.xpose.msrb.mxu1 %v2312_v32  ;;  %v2353_v32 = vsub.f32 %v4532_v19, %v2352_v1 }
 0x2ba   : > { %2430 = vmatpush.xpose.msra.mxu3 %v4409_v4 }
 0x2bb   : > { %2387 = vmatpush.xpose.msra.mxu2 %v4444_v3  ;;  %v2354_v31 = vand.u32 4294901760, %v2353_v32 }
 0x2bd   : > { %2234 = vmatpush.xpose.msrb.mxu0 %v4409_v4  ;;  %2319 = vmatpush.xpose.msrb.mxu1 %v2318_v48 }
 0x2be   : > { %2432 = vmatpush.xpose.msra.mxu3 %v4423_v13 }
 0x2bf   : > { %2390 = vmatpush.xpose.msra.mxu2 %v4457_v21 }
 0x2c1   : > { %2236 = vmatpush.xpose.msrb.mxu0 %v4423_v13  ;;  %2325 = vmatpush.xpose.msrb.mxu1 %v2324_v30 }
 0x2c2   : > { %2434 = vmatpush.xpose.msra.mxu3 %v4436_v27 }
 0x2c3   : > { %2393 = vmatpush.xpose.msra.mxu2 %v4470_v50 }
 0x2c5   : > { %2238 = vmatpush.xpose.msrb.mxu0 %v4436_v27  ;;  %2331 = vmatpush.xpose.msrb.mxu1 %v2330_v42 }
 0x2c6   : > { %2436 = vmatpush.xpose.msra.mxu3 %v4449_v10 }
 0x2c7   : > { %2396 = vmatpush.xpose.msra.mxu2 %v4483_v45 }
 0x2c9   : > { %2240 = vmatpush.xpose.msrb.mxu0 %v4449_v10  ;;  %2337 = vmatpush.xpose.msrb.mxu1 %v2336_v59 }
 0x2ca   : > { %2438 = vmatpush.xpose.msra.mxu3 %v4462_v2 }
 0x2cb   : > { %2399 = vmatpush.xpose.msra.mxu2 %v4496_v61 }
 0x2cd   : > { %2242 = vmatpush.xpose.msrb.mxu0 %v4462_v2  ;;  %2343 = vmatpush.xpose.msrb.mxu1 %v2342_v58 }
 0x2ce   : > { %2440 = vmatpush.xpose.msra.mxu3 %v4475_v12 }
 0x2cf   : > { %2402 = vmatpush.xpose.msra.mxu2 %v4509_v20 }
 0x2d1   : > { %2244 = vmatpush.xpose.msrb.mxu0 %v4475_v12  ;;  %2349 = vmatpush.xpose.msrb.mxu1 %v2348_v25 }
 0x2d2   : > { %2442 = vmatpush.xpose.msra.mxu3 %v4488_v34 }
 0x2d3   : > { %2405 = vmatpush.xpose.msra.mxu2 %v4522_v0 }
 0x2d5   : > { %2246 = vmatpush.xpose.msrb.mxu0 %v4488_v34  ;;  %2355 = vmatpush.xpose.msrb.mxu1 %v2354_v31 }
 0x2d6   : > { %2444 = vmatpush.xpose.msra.mxu3 %v4501_v54 }
 0x2d7   : > { %2408 = vmatpush.xpose.msra.mxu2 %v4532_v19 }
 0x2d9   : > { %2524 = vmatpush.xpose.msra.mxu1 %v4312_v43  ;;  %2248 = vmatpush.xpose.msrb.mxu0 %v4501_v54  ;;  %v1649_v43 = vpop.f32.mrf.mxu1 }
 0x2da   : > { %2446 = vmatpush.xpose.msra.mxu3 %v4514_v51 }
 0x2dd   : > { %2526 = vmatpush.xpose.msra.mxu1 %v4324_v9  ;;  %2250 = vmatpush.xpose.msrb.mxu0 %v4514_v51  ;;  %v1548_v49 = vpop.f32.mrf.mxu0  ;;  %v1703_v9 = vpop.f32.mrf.mxu2 }
 0x2de   : > { %v1650_v56 = vadd.f32 %v1649_v43, %v1548_v49 }
 0x2e1   : > { %2457 = vmatpush.xpose.msra.mxu0 %v2262_v60  ;;  %2528 = vmatpush.xpose.msra.mxu1 %v4337_v14  ;;  %v1742_v60 = vpop.f32.mrf.mxu3  ;;  %v1848_v14 = vpop.f32.mrf.mxu1 }
 0x2e5   : > { %2461 = vmatpush.xpose.msra.mxu0 %v2268_v38  ;;  %2530 = vmatpush.xpose.msra.mxu1 %v4353_v6  ;;  %v1811_v38 = vpop.f32.mrf.mxu0  ;;  %v1704_v6 = vadd.f32 %v1703_v9, %v1650_v56 }
 0x2e9   : > { %2465 = vmatpush.xpose.msra.mxu0 %v2274_v18  ;;  %2532 = vmatpush.xpose.msra.mxu1 %v4361_v29  ;;  %v1743_v18 = vadd.f32 %v1742_v60, %v1704_v6 }
 0x2ea   : > { %v2011_v29 = vpop.f32.mrf.mxu3 }
 0x2eb   : > { %v1812_v40 = vadd.f32 %v1811_v38, %v1743_v18 }
 0x2ed   : > { %2469 = vmatpush.xpose.msra.mxu0 %v2280_v28  ;;  %2534 = vmatpush.xpose.msra.mxu1 %v4377_v11  ;;  %v1849_v52 = vadd.f32 %v1848_v14, %v1812_v40 }
 0x2f1   : > { %2473 = vmatpush.xpose.msra.mxu0 %v2286_v35  ;;  %2536 = vmatpush.xpose.msra.mxu1 %v4394_v41 }
 0x2f3   : > { %v1910_v53 = vpop.f32.mrf.mxu2 }
 0x2f4   : > { %v2012_v11 = vadd.f32 %v2011_v29, %v1910_v53 }
 0x2f5   : > { %2477 = vmatpush.xpose.msra.mxu0 %v2292_v46  ;;  %2538 = vmatpush.xpose.msra.mxu1 %v4409_v4  ;;  %v2790_v46 = vld [vmem:[%s4657_s5] ss:$0 sm:$0xff] }
 0x2f6   : > { %v2217_v22 = vadd.f32 %v2790_v46, %v1849_v52 }
 0x2f9   : > { %2481 = vmatpush.xpose.msra.mxu0 %v2298_v26  ;;  %2540 = vmatpush.xpose.msra.mxu1 %v4423_v13 }
 0x2fd   : > { %2485 = vmatpush.xpose.msra.mxu0 %v2304_v7  ;;  %2542 = vmatpush.xpose.msra.mxu1 %v4436_v27 }
 0x301   : > { %2489 = vmatpush.xpose.msra.mxu0 %v2310_v55  ;;  %2544 = vmatpush.xpose.msra.mxu1 %v4449_v10 }
 0x305   : > { %2493 = vmatpush.xpose.msra.mxu0 %v2316_v23  ;;  %2546 = vmatpush.xpose.msra.mxu1 %v4462_v2 }
 0x309   : > { %2497 = vmatpush.xpose.msra.mxu0 %v2322_v8  ;;  %2548 = vmatpush.xpose.msra.mxu1 %v4475_v12 }
 0x30d   : > { %2501 = vmatpush.xpose.msra.mxu0 %v2328_v39  ;;  %2550 = vmatpush.xpose.msra.mxu1 %v4488_v34 }
 0x311   : > { %2505 = vmatpush.xpose.msra.mxu0 %v2334_v33  ;;  %2552 = vmatpush.xpose.msra.mxu1 %v4501_v54 }
 0x315   : > { %2509 = vmatpush.xpose.msra.mxu0 %v2340_v47  ;;  %2554 = vmatpush.xpose.msra.mxu1 %v4514_v51  ;;  %v2104_v44 = vpop.f32.mrf.mxu1 }
 0x319   : > { %2513 = vmatpush.xpose.msra.mxu0 %v2346_v15 }
 0x31d   : > { %2517 = vmatpush.xpose.msra.mxu0 %v2352_v1  ;;  %v2065_v28 = vpop.f32.mrf.mxu0  ;;  %v2173_v35 = vpop.f32.mrf.mxu2 }
 0x31e   : > { %v2066_v41 = vadd.f32 %v2065_v28, %v2012_v11 }
 0x320   : > { %v2105_v4 = vadd.f32 %v2104_v44, %v2066_v41 }
 0x322   : > { %v2210_v62 = vpop.f32.mrf.mxu3  ;;  %v2174_v13 = vadd.f32 %v2173_v35, %v2105_v4 }
 0x324   : > { %v2211_v26 = vadd.f32 %v2210_v62, %v2174_v13 }
 0x326   : > { %v2218_v27 = vsub.f32 %v2217_v22, %v2211_v26 }
 0x328   : > { %v2251_v7 = vand.u32 4294901760, %v2218_v27 }
 0x32a   : > { %v2252_v3 = vsub.f32 %v2218_v27, %v2251_v7  ;;  %2357 = vmatmul.f32.vlgmr.msrb.gmra.mxu1 %v2251_v7 }
 0x32c   : > { %v2253_v10 = vand.u32 4294901760, %v2252_v3  ;;  %2411 = vmatmul.f32.vlgmr.msra.gmra.mxu2 %v2252_v3 }
 0x32e   : > { %v2254_v55 = vsub.f32 %v2252_v3, %v2253_v10  ;;  %2450 = vmatmul.f32.vlgmr.msra.gmra.mxu3 %v2253_v10 }
 0x330   : > { %v2255_v21 = vand.u32 4294901760, %v2254_v55 }
 0x332   : > { %2256 = vmatmul.f32.vlgmr.msrb.gmra.mxu0 %v2255_v21  ;;  %2556 = vmatmul.f32.vlgmr.msra.gmra.mxu1 %v2251_v7 }
 0x33a   : > { %2519 = vmatmul.f32.vlgmr.msra.gmra.mxu0 %v2251_v7 }
 0x33b   : > { %2867 = shalt.err (!%p2864_p3)
}
 0x33c   : > { %2747 = dma.vmem_to_hbm [thread:$0]  (%p3029_p5), %s2617_s20, 16, %s2619_s21, %s2590_s27   ;;  %v2560_v39 = vld [vmem:[%s4659_s7] sm:$0x1] }
 0x33d   : > { %s2598_s1 = scalar_lea.hbm %s4660_s8, %s3012_s17  ;;  %s355_s18 = scalar_lea.vmem [#allocation2], %s4241_s25 }
 0x33e   : > { %s2600_s20 = sshll.u32 %s355_s18, 4  ;;  %s2602_s21 = sshll.u32 %s2598_s1, 4  ;;  %s2601_s20 = int_to_ptr.vmem [resolvable:$true] %s2600_s20  ;;  %s2603_s21 = int_to_ptr.hbm [resolvable:$true] %s2602_s21 }
 0x33f   : > { %s2581_s27 = scalar_lea.sflag [#allocation3], %s4241_s25  ;;  %s2882_s28 = sshra.s32 %s2603_s21, 4  ;;  %s2883_s28 = int_to_ptr.hbm [resolvable:$true] %s2882_s28 }
 0x340   : > { %s2884_s17 = scalar_lea.hbm %s2883_s28, 1  ;;  %s2888_s30 = scalar_lea.hbm %s4660_s8, 2 }
 0x341   : > { %p2885_p4 = scmp.ne.s32.totalorder %s2883_s28, %s2884_s17  ;;  %p2889_p9 = scmp.lt.s32.totalorder %s2883_s28, %s4660_s8 }
 0x342   : > { %p2890_p10 = scmp.lt.s32.totalorder %s2888_s30, %s2884_s17 }
 0x343   : > { %p2886_p7 = pnand %p2885_p4, %p3029_p5 }
 0x344   : > { %p2891_p11 = por %p2890_p10, %p2889_p9 }
 0x345   : > { %p2887_p8 = pneg %p2886_p7 }
 0x347   : > { %p2892_p12 = pnand %p2891_p11, %p2887_p8 }
 0x3a7   : > { %v2358_v2 = vpop.f32.mrf.mxu1 }
 0x3af   : > { %v2257_v23 = vpop.f32.mrf.mxu0  ;;  %v2412_v12 = vpop.f32.mrf.mxu2 }
 0x3b0   : > { %v2359_v50 = vadd.f32 %v2358_v2, %v2257_v23  ;;  %v2557_v17 = vpop.f32.mrf.mxu1 }
 0x3b1   : > { %v2451_v45 = vpop.f32.mrf.mxu3 }
 0x3b2   : > { %v2413_v8 = vadd.f32 %v2412_v12, %v2359_v50 }
 0x3b4   : > { %v2452_v57 = vadd.f32 %v2451_v45, %v2413_v8 }
 0x3b7   : > { %v2520_v34 = vpop.f32.mrf.mxu0 }
 0x3b8   : > { %v2521_v48 = vadd.f32 %v2520_v34, %v2452_v57 }
 0x3ba   : > { %v2558_v61 = vadd.f32 %v2557_v17, %v2521_v48 }
 0x3bc   : > { %v2561_v5 = vadd.f32 %v2560_v39, %v2558_v61 }
 0x3be   : > { %2562 = vst [vmem:[%s355_s18] sm:$0x1] %v2561_v5 }
 0x3bf   : > { %2895 = shalt.err (!%p2892_p12)
}
 0x3c0   : > { %2746 = dma.vmem_to_hbm [thread:$0]  (%p3029_p5), %s2601_s20, 16, %s2603_s21, %s2581_s27  }
 0x3c1 PF: > { %p2757_p13 = scmp.ge.s32.totalorder %s2934_s16, 2  ;;  %s2630_s25 = sand.u32 1, %s2922_s13  }
 0x3c2   : > { %s2631_s1 = scalar_lea.sflag [#allocation3], %s2630_s25 }
 0x3c3   : > { %p2751_p0 = pnand %p2757_p13, %p3033_p6 }
 0x3c5   : > { %p2752_p1 = pneg %p2751_p0 }
 0x3c7   : > { %2913 = dma.done.wait (%p2752_p1), %s2631_s1, 16  }
 0x3c8   : > { %2915 = vsyncadd (%p2752_p1), %s2631_s1, 4294967280  ;;  %s2648_s26 = scalar_lea.sflag [#allocation5], %s2630_s25 }
 0x3c9   : > { %2917 = dma.done.wait (%p2752_p1), %s2648_s26, 16  }
 0x3ca   : > { %2919 = vsyncadd (%p2752_p1), %s2648_s26, 4294967280  ;;  %p24_p5 = scmp.ge.s32.totalorder %s3016_s19, 4   ;;  %s4695_s13 = smov %s2926_s14 }
 0x3cb   : > { %s4696_s14 = smov %s2930_s15  ;;  %s4697_s15 = smov %s3027_s22 }
 0x3cc   : > { %s4698_s16 = smov %s3016_s19  ;;  %26 = sbr.rel (!%p24_p5) target bundleno = 9 (0x9), region = 116 }
 0x3d1   :  { %2653 = vsyncpa [#allocation3], 1 }
 0x3d2   :  { %2655 = vsyncpa [#allocation3 + $0x1], 1 }
 0x3d3   :  { %2656 = vsyncpa [#allocation5], 1 }
 0x3d4   :  { %2658 = vsyncpa [#allocation5 + $0x1], 1 }

</bundles_post_ra>
